<compile_context>
chip_gen: v6e
topology: v6e:2x2x1
jax: 0.10.0
libtpu: 0.0.40
codegen_flags: <defaults>
</compile_context>

<pallas_src>
import jax
import jax.numpy as jnp
from jax import lax
from jax.experimental import pallas as pl
from jax.experimental.pallas import tpu as pltpu

# ---- hyperparameters of the TopologicalAutoencoder wrapper (Python scalars only) ----
LAM = 1.0               # self.lam
MIN_PERSISTENCE = 1.0   # VietorisRipsComplex(min_persistence=1)

# ---- problem sizes (small, deterministic) ----
N = 16    # points per cloud
D = 16    # input feature dimension
H = 32    # MLP hidden dimension
L = 4     # latent dimension
W = 32    # packed lane width = max(D, H, L); zero padding is loss-neutral

BIG = 1e30
EPS = 1e-12


def _fused_kernel(x_ref, p_ref, loss_ref):
    n = N
    x = x_ref[...]                        # (N, W); columns D: are zero

    # ---- packed parameter slabs (static, 8-aligned row slices of one blob) ----
    w_e1 = p_ref[0:32, :]                 # encode 1: real (D, H) in rows 0:D
    w_e2 = p_ref[32:64, :]                # encode 2: real (H, L) in cols 0:L
    w_d1 = p_ref[64:96, :]                # decode 1: real (L, H) in rows 0:L
    w_d2 = p_ref[96:128, :]               # decode 2: real (H, D) in cols 0:D
    bias = p_ref[128:136, :]              # rows 0..3 = be1, be2, bd1, bd2 (zero padded)
    b_e1 = bias[0:1, :]
    b_e2 = bias[1:2, :]
    b_d1 = bias[2:3, :]
    b_d2 = bias[3:4, :]

    # ---- autoencoder: z = encode(x); geom_loss = MSE(decode(z), x) ----
    h = jnp.maximum(jnp.dot(x, w_e1, preferred_element_type=jnp.float32) + b_e1, 0.0)
    z = jnp.dot(h, w_e2, preferred_element_type=jnp.float32) + b_e2        # (N, W), cols L: == 0
    hd = jnp.maximum(jnp.dot(z, w_d1, preferred_element_type=jnp.float32) + b_d1, 0.0)
    xr = jnp.dot(hd, w_d2, preferred_element_type=jnp.float32) + b_d2      # (N, W), cols D: == 0
    diff = xr - x
    geom = jnp.sum(jnp.sum(diff * diff, axis=-1, keepdims=True),
                   axis=0, keepdims=True) * (1.0 / float(N * D))           # (1,1)

    # ---- pairwise Euclidean distance matrices (padding does not change them) ----
    def pdist(p):
        g = lax.dot_general(p, p, (((1,), (1,)), ((), ())),
                            preferred_element_type=jnp.float32)            # p @ p.T, (N,N)
        eye = (lax.broadcasted_iota(jnp.int32, (n, n), 0)
               == lax.broadcasted_iota(jnp.int32, (n, n), 1))
        gd = jnp.where(eye, g, 0.0)                                        # diag(g) = ||p_i||^2
        sq_col = jnp.sum(gd, axis=1, keepdims=True)                        # (N,1)
        sq_row = jnp.sum(gd, axis=0, keepdims=True)                        # (1,N)
        d2 = jnp.maximum(sq_col + sq_row - 2.0 * g, 0.0)
        return jnp.sqrt(d2)

    dx = pdist(x)
    dz = pdist(z)

    def max2(m):
        return jnp.max(jnp.max(m, axis=-1, keepdims=True), axis=0, keepdims=True)

    inv_x = 1.0 / jnp.maximum(max2(dx), EPS)                               # (1,1)
    inv_z = 1.0 / jnp.maximum(max2(dz), EPS)

    # ---- dual Prim MST == finite dim-0 VR pairings of X (row 0) and Z (row 1) ----
    lane = lax.broadcasted_iota(jnp.int32, (2, n), 1)
    srow = lax.broadcasted_iota(jnp.int32, (2, n), 0)
    is_x = srow == 0

    in_tree = lane == 0                                                    # (2,N) bool
    min_dist = jnp.full((2, n), BIG, jnp.float32)                          # self-space frontier
    min_other = jnp.zeros((2, n), jnp.float32)                             # other-space mirror

    def relax(v_onehot, in_tree, min_dist, min_other):
        # rows of Dx / Dz at the newly added vertex of each instance (idle-MXU matmuls)
        rx = jnp.dot(v_onehot, dx, preferred_element_type=jnp.float32)     # (2,N)
        rz = jnp.dot(v_onehot, dz, preferred_element_type=jnp.float32)     # (2,N)
        d_row = jnp.where(is_x, rx, rz)                                    # own-space distances
        o_row = jnp.where(is_x, rz, rx)                                    # other-space, same pairs
        # mask by "not in tree": once a vertex joins, its (min_dist, min_other) freeze
        # at exactly (death value, cross distance) for its MST edge.
        better = jnp.logical_and(d_row < min_dist, jnp.logical_not(in_tree))
        return (jnp.where(better, d_row, min_dist),
                jnp.where(better, o_row, min_other))

    # root (vertex 0) relaxation
    min_dist, min_other = relax(jnp.where(lane == 0, 1.0, 0.0),
                                in_tree, min_dist, min_other)

    for _ in range(n - 1):
        dd = jnp.where(in_tree, BIG, min_dist)
        # packed single-reduce argmin: f32 bits are order-preserving for dd >= 0;
        # low 4 mantissa bits <- lane id (unique -> exact one-hot selection).
        bits = lax.bitcast_convert_type(dd, jnp.int32)
        packed = jnp.bitwise_or(jnp.bitwise_and(bits, -16), lane)          # -16 == ~0xF
        pmin = jnp.min(packed, axis=-1, keepdims=True)                     # (2,1), one lane reduce
        sel = packed == pmin                                               # exact one-hot per row
        in_tree = jnp.logical_or(in_tree, sel)
        min_dist, min_other = relax(jnp.where(sel, 1.0, 0.0),
                                    in_tree, min_dist, min_other)

    # ---- SignatureLoss(p=2, dims=[0]): one masked post-loop reduce, no gathers ----
    valid = lane > 0                           # root vertex has no finite pair
    w = jnp.where(valid, min_dist, 0.0)        # death values D_self[pair]
    keep = w > MIN_PERSISTENCE                 # min_persistence=1 filter (strictly greater)
    inv_s = jnp.where(is_x, inv_x, inv_z)
    inv_o = jnp.where(is_x, inv_z, inv_x)
    dterm = w * inv_s - min_other * inv_o
    terms = jnp.where(keep, dterm * dterm, 0.0)
    topo = 0.5 * jnp.sum(jnp.sum(terms, axis=-1, keepdims=True),
                         axis=0, keepdims=True)                            # (1,1)

    loss_ref[...] = geom + LAM * topo


def _pack_params(params):
    """Zero-pad the 8 parameter tensors to a common (32, 32)/(1, 32) layout and pack
    them into one (136, 32) f32 blob with 8-row-aligned sections (1 DMA instead of 8)."""
    we1, be1, we2, be2, wd1, bd1, wd2, bd2 = params

    def padw(m):
        m = jnp.asarray(m, jnp.float32)
        r, c = m.shape
        return jnp.pad(m, ((0, W - r), (0, W - c)))

    def padb(b):
        b = jnp.asarray(b, jnp.float32).reshape(1, -1)
        return jnp.pad(b, ((0, 0), (0, W - b.shape[-1])))

    bias_blk = jnp.concatenate(
        [padb(be1), padb(be2), padb(bd1), padb(bd2), jnp.zeros((4, W), jnp.float32)],
        axis=0)                                                            # (8, W)
    return jnp.concatenate([padw(we1), padw(we2), padw(wd1), padw(wd2), bias_blk],
                           axis=0)                                         # (136, W)


def topological_autoencoder_loss(x, params):
    x_pad = jnp.pad(jnp.asarray(x, jnp.float32), ((0, 0), (0, W - x.shape[-1])))
    blob = _pack_params(params)
    loss = pl.pallas_call(
        _fused_kernel,
        out_shape=jax.ShapeDtypeStruct((1, 1), jnp.float32),
        in_specs=[pl.BlockSpec(memory_space=pltpu.MemorySpace.VMEM),
                  pl.BlockSpec(memory_space=pltpu.MemorySpace.VMEM)],
        out_specs=pl.BlockSpec(memory_space=pltpu.MemorySpace.VMEM),
    )(x_pad, blob)
    return loss[0, 0]


if __name__ == "__main__":
    key = jax.random.PRNGKey(0)
    kx, k1, k2, k3, k4 = jax.random.split(key, 5)
    x = jax.random.normal(kx, (N, D), jnp.float32)
    params = (
        jax.random.normal(k1, (D, H), jnp.float32) / jnp.sqrt(float(D)),
        jnp.zeros((1, H), jnp.float32),
        jax.random.normal(k2, (H, L), jnp.float32) / jnp.sqrt(float(H)),
        jnp.zeros((1, L), jnp.float32),
        jax.random.normal(k3, (L, H), jnp.float32) / jnp.sqrt(float(L)),
        jnp.zeros((1, H), jnp.float32),
        jax.random.normal(k4, (H, D), jnp.float32) / jnp.sqrt(float(H)),
        jnp.zeros((1, D), jnp.float32),
    )

    loss = jax.jit(topological_autoencoder_loss)(x, params)
    jax.block_until_ready(loss)
    assert jnp.isfinite(loss)
    print("KERNEL_OK")
</pallas_src>

<mosaic_0001>
module attributes {stable_mosaic.version = 11 : i64} {
  func.func @_fused_kernel(%arg0: memref<16x32xf32, #tpu.memory_space<vmem>>, %arg1: memref<136x32xf32, #tpu.memory_space<vmem>>, %arg2: memref<1x1xf32, #tpu.memory_space<vmem>>) attributes {dimension_semantics = [], scalar_prefetch = 0 : i64, scratch_operands = 0 : i64, tpu.core_type = #tpu.core_type<tc>} {
    %c0 = arith.constant 0 : index
    %c0_0 = arith.constant 0 : index
    %0 = vector.load %arg0[%c0, %c0_0] : memref<16x32xf32, #tpu.memory_space<vmem>>, vector<16x32xf32>
    %c0_1 = arith.constant 0 : index
    %c0_2 = arith.constant 0 : index
    %1 = vector.load %arg1[%c0_1, %c0_2] : memref<136x32xf32, #tpu.memory_space<vmem>>, vector<32x32xf32>
    %c32 = arith.constant 32 : index
    %c0_3 = arith.constant 0 : index
    %2 = vector.load %arg1[%c32, %c0_3] : memref<136x32xf32, #tpu.memory_space<vmem>>, vector<32x32xf32>
    %c64 = arith.constant 64 : index
    %c0_4 = arith.constant 0 : index
    %3 = vector.load %arg1[%c64, %c0_4] : memref<136x32xf32, #tpu.memory_space<vmem>>, vector<32x32xf32>
    %c96 = arith.constant 96 : index
    %c0_5 = arith.constant 0 : index
    %4 = vector.load %arg1[%c96, %c0_5] : memref<136x32xf32, #tpu.memory_space<vmem>>, vector<32x32xf32>
    %c128 = arith.constant 128 : index
    %c0_6 = arith.constant 0 : index
    %5 = vector.load %arg1[%c128, %c0_6] : memref<136x32xf32, #tpu.memory_space<vmem>>, vector<8x32xf32>
    %6 = vector.extract_strided_slice %5 {offsets = [0, 0], sizes = [1, 32], strides = [1, 1]} : vector<8x32xf32> to vector<1x32xf32>
    %7 = vector.extract_strided_slice %5 {offsets = [1, 0], sizes = [1, 32], strides = [1, 1]} : vector<8x32xf32> to vector<1x32xf32>
    %8 = vector.extract_strided_slice %5 {offsets = [2, 0], sizes = [1, 32], strides = [1, 1]} : vector<8x32xf32> to vector<1x32xf32>
    %9 = vector.extract_strided_slice %5 {offsets = [3, 0], sizes = [1, 32], strides = [1, 1]} : vector<8x32xf32> to vector<1x32xf32>
    %cst = arith.constant dense<0.000000e+00> : vector<16x32xf32>
    %10 = tpu.matmul %0, %1, %cst {dimension_numbers = #tpu.dot_dimension_numbers<[1], [0], [0], [1], [0, 0, 1, 1], [], []>} : vector<16x32xf32>, vector<32x32xf32>, vector<16x32xf32> -> vector<16x32xf32>
    %11 = vector.broadcast %6 : vector<1x32xf32> to vector<16x32xf32>
    %12 = arith.addf %10, %11 : vector<16x32xf32>
    %cst_7 = arith.constant 0.000000e+00 : f32
    %13 = vector.broadcast %cst_7 : f32 to vector<16x32xf32>
    %14 = arith.maximumf %12, %13 : vector<16x32xf32>
    %cst_8 = arith.constant dense<0.000000e+00> : vector<16x32xf32>
    %15 = tpu.matmul %14, %2, %cst_8 {dimension_numbers = #tpu.dot_dimension_numbers<[1], [0], [0], [1], [0, 0, 1, 1], [], []>} : vector<16x32xf32>, vector<32x32xf32>, vector<16x32xf32> -> vector<16x32xf32>
    %16 = vector.broadcast %7 : vector<1x32xf32> to vector<16x32xf32>
    %17 = arith.addf %15, %16 : vector<16x32xf32>
    %cst_9 = arith.constant dense<0.000000e+00> : vector<16x32xf32>
    %18 = tpu.matmul %17, %3, %cst_9 {dimension_numbers = #tpu.dot_dimension_numbers<[1], [0], [0], [1], [0, 0, 1, 1], [], []>} : vector<16x32xf32>, vector<32x32xf32>, vector<16x32xf32> -> vector<16x32xf32>
    %19 = vector.broadcast %8 : vector<1x32xf32> to vector<16x32xf32>
    %20 = arith.addf %18, %19 : vector<16x32xf32>
    %cst_10 = arith.constant 0.000000e+00 : f32
    %21 = vector.broadcast %cst_10 : f32 to vector<16x32xf32>
    %22 = arith.maximumf %20, %21 : vector<16x32xf32>
    %cst_11 = arith.constant dense<0.000000e+00> : vector<16x32xf32>
    %23 = tpu.matmul %22, %4, %cst_11 {dimension_numbers = #tpu.dot_dimension_numbers<[1], [0], [0], [1], [0, 0, 1, 1], [], []>} : vector<16x32xf32>, vector<32x32xf32>, vector<16x32xf32> -> vector<16x32xf32>
    %24 = vector.broadcast %9 : vector<1x32xf32> to vector<16x32xf32>
    %25 = arith.addf %23, %24 : vector<16x32xf32>
    %26 = arith.subf %25, %0 : vector<16x32xf32>
    %27 = arith.mulf %26, %26 : vector<16x32xf32>
    %cst_12 = arith.constant dense<0.000000e+00> : vector<16xf32>
    %28 = vector.multi_reduction <add>, %27, %cst_12 [1] : vector<16x32xf32> to vector<16xf32>
    %29 = vector.shape_cast %28 : vector<16xf32> to vector<16x1xf32>
    %cst_13 = arith.constant dense<0.000000e+00> : vector<1xf32>
    %30 = vector.multi_reduction <add>, %29, %cst_13 [0] : vector<16x1xf32> to vector<1xf32>
    %31 = vector.shape_cast %30 : vector<1xf32> to vector<1x1xf32>
    %cst_14 = arith.constant 3.906250e-03 : f32
    %32 = vector.broadcast %cst_14 : f32 to vector<1x1xf32>
    %33 = arith.mulf %31, %32 : vector<1x1xf32>
    %cst_15 = arith.constant dense<0.000000e+00> : vector<16x16xf32>
    %34 = tpu.matmul %0, %0, %cst_15 {dimension_numbers = #tpu.dot_dimension_numbers<[1], [1], [0], [0], [0, 0, 1, 0], [], []>} : vector<16x32xf32>, vector<16x32xf32>, vector<16x16xf32> -> vector<16x16xf32>
    %35 = tpu.iota {dimensions = array<i32: 0>} : vector<16x16xi32>
    %36 = tpu.iota {dimensions = array<i32: 1>} : vector<16x16xi32>
    %37 = arith.cmpi eq, %35, %36 : vector<16x16xi32>
    %cst_16 = arith.constant 0.000000e+00 : f32
    %38 = vector.broadcast %cst_16 : f32 to vector<16x16xf32>
    %39 = arith.select %37, %34, %38 : vector<16x16xi1>, vector<16x16xf32>
    %cst_17 = arith.constant dense<0.000000e+00> : vector<16xf32>
    %40 = vector.multi_reduction <add>, %39, %cst_17 [1] : vector<16x16xf32> to vector<16xf32>
    %41 = vector.shape_cast %40 : vector<16xf32> to vector<16x1xf32>
    %cst_18 = arith.constant dense<0.000000e+00> : vector<16xf32>
    %42 = vector.multi_reduction <add>, %39, %cst_18 [0] : vector<16x16xf32> to vector<16xf32>
    %43 = vector.shape_cast %42 : vector<16xf32> to vector<1x16xf32>
    %44 = vector.broadcast %41 : vector<16x1xf32> to vector<16x16xf32>
    %45 = vector.broadcast %43 : vector<1x16xf32> to vector<16x16xf32>
    %46 = arith.addf %44, %45 : vector<16x16xf32>
    %cst_19 = arith.constant 2.000000e+00 : f32
    %47 = vector.broadcast %cst_19 : f32 to vector<16x16xf32>
    %48 = arith.mulf %47, %34 : vector<16x16xf32>
    %49 = arith.subf %46, %48 : vector<16x16xf32>
    %cst_20 = arith.constant 0.000000e+00 : f32
    %50 = vector.broadcast %cst_20 : f32 to vector<16x16xf32>
    %51 = arith.maximumf %49, %50 : vector<16x16xf32>
    %52 = math.sqrt %51 : vector<16x16xf32>
    %cst_21 = arith.constant dense<0.000000e+00> : vector<16x16xf32>
    %53 = tpu.matmul %17, %17, %cst_21 {dimension_numbers = #tpu.dot_dimension_numbers<[1], [1], [0], [0], [0, 0, 1, 0], [], []>} : vector<16x32xf32>, vector<16x32xf32>, vector<16x16xf32> -> vector<16x16xf32>
    %54 = tpu.iota {dimensions = array<i32: 0>} : vector<16x16xi32>
    %55 = tpu.iota {dimensions = array<i32: 1>} : vector<16x16xi32>
    %56 = arith.cmpi eq, %54, %55 : vector<16x16xi32>
    %cst_22 = arith.constant 0.000000e+00 : f32
    %57 = vector.broadcast %cst_22 : f32 to vector<16x16xf32>
    %58 = arith.select %56, %53, %57 : vector<16x16xi1>, vector<16x16xf32>
    %cst_23 = arith.constant dense<0.000000e+00> : vector<16xf32>
    %59 = vector.multi_reduction <add>, %58, %cst_23 [1] : vector<16x16xf32> to vector<16xf32>
    %60 = vector.shape_cast %59 : vector<16xf32> to vector<16x1xf32>
    %cst_24 = arith.constant dense<0.000000e+00> : vector<16xf32>
    %61 = vector.multi_reduction <add>, %58, %cst_24 [0] : vector<16x16xf32> to vector<16xf32>
    %62 = vector.shape_cast %61 : vector<16xf32> to vector<1x16xf32>
    %63 = vector.broadcast %60 : vector<16x1xf32> to vector<16x16xf32>
    %64 = vector.broadcast %62 : vector<1x16xf32> to vector<16x16xf32>
    %65 = arith.addf %63, %64 : vector<16x16xf32>
    %cst_25 = arith.constant 2.000000e+00 : f32
    %66 = vector.broadcast %cst_25 : f32 to vector<16x16xf32>
    %67 = arith.mulf %66, %53 : vector<16x16xf32>
    %68 = arith.subf %65, %67 : vector<16x16xf32>
    %cst_26 = arith.constant 0.000000e+00 : f32
    %69 = vector.broadcast %cst_26 : f32 to vector<16x16xf32>
    %70 = arith.maximumf %68, %69 : vector<16x16xf32>
    %71 = math.sqrt %70 : vector<16x16xf32>
    %cst_27 = arith.constant dense<0xFF800000> : vector<16xf32>
    %72 = vector.multi_reduction <maximumf>, %52, %cst_27 [1] : vector<16x16xf32> to vector<16xf32>
    %73 = vector.shape_cast %72 : vector<16xf32> to vector<16x1xf32>
    %cst_28 = arith.constant dense<0xFF800000> : vector<1xf32>
    %74 = vector.multi_reduction <maximumf>, %73, %cst_28 [0] : vector<16x1xf32> to vector<1xf32>
    %75 = vector.shape_cast %74 : vector<1xf32> to vector<1x1xf32>
    %cst_29 = arith.constant 9.99999996E-13 : f32
    %76 = vector.broadcast %cst_29 : f32 to vector<1x1xf32>
    %77 = arith.maximumf %75, %76 : vector<1x1xf32>
    %cst_30 = arith.constant 1.000000e+00 : f32
    %78 = vector.broadcast %cst_30 : f32 to vector<1x1xf32>
    %79 = arith.divf %78, %77 : vector<1x1xf32>
    %cst_31 = arith.constant dense<0xFF800000> : vector<16xf32>
    %80 = vector.multi_reduction <maximumf>, %71, %cst_31 [1] : vector<16x16xf32> to vector<16xf32>
    %81 = vector.shape_cast %80 : vector<16xf32> to vector<16x1xf32>
    %cst_32 = arith.constant dense<0xFF800000> : vector<1xf32>
    %82 = vector.multi_reduction <maximumf>, %81, %cst_32 [0] : vector<16x1xf32> to vector<1xf32>
    %83 = vector.shape_cast %82 : vector<1xf32> to vector<1x1xf32>
    %cst_33 = arith.constant 9.99999996E-13 : f32
    %84 = vector.broadcast %cst_33 : f32 to vector<1x1xf32>
    %85 = arith.maximumf %83, %84 : vector<1x1xf32>
    %cst_34 = arith.constant 1.000000e+00 : f32
    %86 = vector.broadcast %cst_34 : f32 to vector<1x1xf32>
    %87 = arith.divf %86, %85 : vector<1x1xf32>
    %88 = tpu.iota {dimensions = array<i32: 1>} : vector<2x16xi32>
    %89 = tpu.iota {dimensions = array<i32: 0>} : vector<2x16xi32>
    %c0_i32 = arith.constant 0 : i32
    %90 = vector.broadcast %c0_i32 : i32 to vector<2x16xi32>
    %91 = arith.cmpi eq, %89, %90 : vector<2x16xi32>
    %c0_i32_35 = arith.constant 0 : i32
    %92 = vector.broadcast %c0_i32_35 : i32 to vector<2x16xi32>
    %93 = arith.cmpi eq, %88, %92 : vector<2x16xi32>
    %cst_36 = arith.constant 1.000000e+30 : f32
    %94 = vector.broadcast %cst_36 : f32 to vector<2x16xf32>
    %cst_37 = arith.constant 0.000000e+00 : f32
    %95 = vector.broadcast %cst_37 : f32 to vector<2x16xf32>
    %c0_i32_38 = arith.constant 0 : i32
    %96 = vector.broadcast %c0_i32_38 : i32 to vector<2x16xi32>
    %97 = arith.cmpi eq, %88, %96 : vector<2x16xi32>
    %cst_39 = arith.constant 1.000000e+00 : f32
    %cst_40 = arith.constant 0.000000e+00 : f32
    %98 = vector.broadcast %cst_39 : f32 to vector<2x16xf32>
    %99 = vector.broadcast %cst_40 : f32 to vector<2x16xf32>
    %100 = arith.select %97, %98, %99 : vector<2x16xi1>, vector<2x16xf32>
    %cst_41 = arith.constant dense<0.000000e+00> : vector<2x16xf32>
    %101 = tpu.matmul %100, %52, %cst_41 {dimension_numbers = #tpu.dot_dimension_numbers<[1], [0], [0], [1], [0, 0, 1, 1], [], []>} : vector<2x16xf32>, vector<16x16xf32>, vector<2x16xf32> -> vector<2x16xf32>
    %cst_42 = arith.constant dense<0.000000e+00> : vector<2x16xf32>
    %102 = tpu.matmul %100, %71, %cst_42 {dimension_numbers = #tpu.dot_dimension_numbers<[1], [0], [0], [1], [0, 0, 1, 1], [], []>} : vector<2x16xf32>, vector<16x16xf32>, vector<2x16xf32> -> vector<2x16xf32>
    %103 = arith.select %91, %101, %102 : vector<2x16xi1>, vector<2x16xf32>
    %104 = arith.select %91, %102, %101 : vector<2x16xi1>, vector<2x16xf32>
    %105 = arith.cmpf olt, %103, %94 : vector<2x16xf32>
    %cst_43 = arith.constant dense<true> : vector<2x16xi1>
    %106 = arith.xori %93, %cst_43 : vector<2x16xi1>
    %107 = arith.andi %105, %106 : vector<2x16xi1>
    %108 = arith.select %107, %103, %94 : vector<2x16xi1>, vector<2x16xf32>
    %109 = arith.select %107, %104, %95 : vector<2x16xi1>, vector<2x16xf32>
    %cst_44 = arith.constant 1.000000e+30 : f32
    %110 = vector.broadcast %cst_44 : f32 to vector<2x16xf32>
    %111 = arith.select %93, %110, %108 : vector<2x16xi1>, vector<2x16xf32>
    %112 = tpu.bitcast %111 : vector<2x16xf32> -> vector<2x16xi32>
    %c-16_i32 = arith.constant -16 : i32
    %113 = vector.broadcast %c-16_i32 : i32 to vector<2x16xi32>
    %114 = arith.andi %112, %113 : vector<2x16xi32>
    %115 = arith.ori %114, %88 : vector<2x16xi32>
    %cst_45 = arith.constant dense<2147483647> : vector<2xi32>
    %116 = vector.multi_reduction <minsi>, %115, %cst_45 [1] : vector<2x16xi32> to vector<2xi32>
    %117 = vector.shape_cast %116 : vector<2xi32> to vector<2x1xi32>
    %118 = vector.broadcast %117 : vector<2x1xi32> to vector<2x16xi32>
    %119 = arith.cmpi eq, %115, %118 : vector<2x16xi32>
    %120 = arith.ori %93, %119 : vector<2x16xi1>
    %cst_46 = arith.constant 1.000000e+00 : f32
    %cst_47 = arith.constant 0.000000e+00 : f32
    %121 = vector.broadcast %cst_46 : f32 to vector<2x16xf32>
    %122 = vector.broadcast %cst_47 : f32 to vector<2x16xf32>
    %123 = arith.select %119, %121, %122 : vector<2x16xi1>, vector<2x16xf32>
    %cst_48 = arith.constant dense<0.000000e+00> : vector<2x16xf32>
    %124 = tpu.matmul %123, %52, %cst_48 {dimension_numbers = #tpu.dot_dimension_numbers<[1], [0], [0], [1], [0, 0, 1, 1], [], []>} : vector<2x16xf32>, vector<16x16xf32>, vector<2x16xf32> -> vector<2x16xf32>
    %cst_49 = arith.constant dense<0.000000e+00> : vector<2x16xf32>
    %125 = tpu.matmul %123, %71, %cst_49 {dimension_numbers = #tpu.dot_dimension_numbers<[1], [0], [0], [1], [0, 0, 1, 1], [], []>} : vector<2x16xf32>, vector<16x16xf32>, vector<2x16xf32> -> vector<2x16xf32>
    %126 = arith.select %91, %124, %125 : vector<2x16xi1>, vector<2x16xf32>
    %127 = arith.select %91, %125, %124 : vector<2x16xi1>, vector<2x16xf32>
    %128 = arith.cmpf olt, %126, %108 : vector<2x16xf32>
    %cst_50 = arith.constant dense<true> : vector<2x16xi1>
    %129 = arith.xori %120, %cst_50 : vector<2x16xi1>
    %130 = arith.andi %128, %129 : vector<2x16xi1>
    %131 = arith.select %130, %126, %108 : vector<2x16xi1>, vector<2x16xf32>
    %132 = arith.select %130, %127, %109 : vector<2x16xi1>, vector<2x16xf32>
    %cst_51 = arith.constant 1.000000e+30 : f32
    %133 = vector.broadcast %cst_51 : f32 to vector<2x16xf32>
    %134 = arith.select %120, %133, %131 : vector<2x16xi1>, vector<2x16xf32>
    %135 = tpu.bitcast %134 : vector<2x16xf32> -> vector<2x16xi32>
    %c-16_i32_52 = arith.constant -16 : i32
    %136 = vector.broadcast %c-16_i32_52 : i32 to vector<2x16xi32>
    %137 = arith.andi %135, %136 : vector<2x16xi32>
    %138 = arith.ori %137, %88 : vector<2x16xi32>
    %cst_53 = arith.constant dense<2147483647> : vector<2xi32>
    %139 = vector.multi_reduction <minsi>, %138, %cst_53 [1] : vector<2x16xi32> to vector<2xi32>
    %140 = vector.shape_cast %139 : vector<2xi32> to vector<2x1xi32>
    %141 = vector.broadcast %140 : vector<2x1xi32> to vector<2x16xi32>
    %142 = arith.cmpi eq, %138, %141 : vector<2x16xi32>
    %143 = arith.ori %120, %142 : vector<2x16xi1>
    %cst_54 = arith.constant 1.000000e+00 : f32
    %cst_55 = arith.constant 0.000000e+00 : f32
    %144 = vector.broadcast %cst_54 : f32 to vector<2x16xf32>
    %145 = vector.broadcast %cst_55 : f32 to vector<2x16xf32>
    %146 = arith.select %142, %144, %145 : vector<2x16xi1>, vector<2x16xf32>
    %cst_56 = arith.constant dense<0.000000e+00> : vector<2x16xf32>
    %147 = tpu.matmul %146, %52, %cst_56 {dimension_numbers = #tpu.dot_dimension_numbers<[1], [0], [0], [1], [0, 0, 1, 1], [], []>} : vector<2x16xf32>, vector<16x16xf32>, vector<2x16xf32> -> vector<2x16xf32>
    %cst_57 = arith.constant dense<0.000000e+00> : vector<2x16xf32>
    %148 = tpu.matmul %146, %71, %cst_57 {dimension_numbers = #tpu.dot_dimension_numbers<[1], [0], [0], [1], [0, 0, 1, 1], [], []>} : vector<2x16xf32>, vector<16x16xf32>, vector<2x16xf32> -> vector<2x16xf32>
    %149 = arith.select %91, %147, %148 : vector<2x16xi1>, vector<2x16xf32>
    %150 = arith.select %91, %148, %147 : vector<2x16xi1>, vector<2x16xf32>
    %151 = arith.cmpf olt, %149, %131 : vector<2x16xf32>
    %cst_58 = arith.constant dense<true> : vector<2x16xi1>
    %152 = arith.xori %143, %cst_58 : vector<2x16xi1>
    %153 = arith.andi %151, %152 : vector<2x16xi1>
    %154 = arith.select %153, %149, %131 : vector<2x16xi1>, vector<2x16xf32>
    %155 = arith.select %153, %150, %132 : vector<2x16xi1>, vector<2x16xf32>
    %cst_59 = arith.constant 1.000000e+30 : f32
    %156 = vector.broadcast %cst_59 : f32 to vector<2x16xf32>
    %157 = arith.select %143, %156, %154 : vector<2x16xi1>, vector<2x16xf32>
    %158 = tpu.bitcast %157 : vector<2x16xf32> -> vector<2x16xi32>
    %c-16_i32_60 = arith.constant -16 : i32
    %159 = vector.broadcast %c-16_i32_60 : i32 to vector<2x16xi32>
    %160 = arith.andi %158, %159 : vector<2x16xi32>
    %161 = arith.ori %160, %88 : vector<2x16xi32>
    %cst_61 = arith.constant dense<2147483647> : vector<2xi32>
    %162 = vector.multi_reduction <minsi>, %161, %cst_61 [1] : vector<2x16xi32> to vector<2xi32>
    %163 = vector.shape_cast %162 : vector<2xi32> to vector<2x1xi32>
    %164 = vector.broadcast %163 : vector<2x1xi32> to vector<2x16xi32>
    %165 = arith.cmpi eq, %161, %164 : vector<2x16xi32>
    %166 = arith.ori %143, %165 : vector<2x16xi1>
    %cst_62 = arith.constant 1.000000e+00 : f32
    %cst_63 = arith.constant 0.000000e+00 : f32
    %167 = vector.broadcast %cst_62 : f32 to vector<2x16xf32>
    %168 = vector.broadcast %cst_63 : f32 to vector<2x16xf32>
    %169 = arith.select %165, %167, %168 : vector<2x16xi1>, vector<2x16xf32>
    %cst_64 = arith.constant dense<0.000000e+00> : vector<2x16xf32>
    %170 = tpu.matmul %169, %52, %cst_64 {dimension_numbers = #tpu.dot_dimension_numbers<[1], [0], [0], [1], [0, 0, 1, 1], [], []>} : vector<2x16xf32>, vector<16x16xf32>, vector<2x16xf32> -> vector<2x16xf32>
    %cst_65 = arith.constant dense<0.000000e+00> : vector<2x16xf32>
    %171 = tpu.matmul %169, %71, %cst_65 {dimension_numbers = #tpu.dot_dimension_numbers<[1], [0], [0], [1], [0, 0, 1, 1], [], []>} : vector<2x16xf32>, vector<16x16xf32>, vector<2x16xf32> -> vector<2x16xf32>
    %172 = arith.select %91, %170, %171 : vector<2x16xi1>, vector<2x16xf32>
    %173 = arith.select %91, %171, %170 : vector<2x16xi1>, vector<2x16xf32>
    %174 = arith.cmpf olt, %172, %154 : vector<2x16xf32>
    %cst_66 = arith.constant dense<true> : vector<2x16xi1>
    %175 = arith.xori %166, %cst_66 : vector<2x16xi1>
    %176 = arith.andi %174, %175 : vector<2x16xi1>
    %177 = arith.select %176, %172, %154 : vector<2x16xi1>, vector<2x16xf32>
    %178 = arith.select %176, %173, %155 : vector<2x16xi1>, vector<2x16xf32>
    %cst_67 = arith.constant 1.000000e+30 : f32
    %179 = vector.broadcast %cst_67 : f32 to vector<2x16xf32>
    %180 = arith.select %166, %179, %177 : vector<2x16xi1>, vector<2x16xf32>
    %181 = tpu.bitcast %180 : vector<2x16xf32> -> vector<2x16xi32>
    %c-16_i32_68 = arith.constant -16 : i32
    %182 = vector.broadcast %c-16_i32_68 : i32 to vector<2x16xi32>
    %183 = arith.andi %181, %182 : vector<2x16xi32>
    %184 = arith.ori %183, %88 : vector<2x16xi32>
    %cst_69 = arith.constant dense<2147483647> : vector<2xi32>
    %185 = vector.multi_reduction <minsi>, %184, %cst_69 [1] : vector<2x16xi32> to vector<2xi32>
    %186 = vector.shape_cast %185 : vector<2xi32> to vector<2x1xi32>
    %187 = vector.broadcast %186 : vector<2x1xi32> to vector<2x16xi32>
    %188 = arith.cmpi eq, %184, %187 : vector<2x16xi32>
    %189 = arith.ori %166, %188 : vector<2x16xi1>
    %cst_70 = arith.constant 1.000000e+00 : f32
    %cst_71 = arith.constant 0.000000e+00 : f32
    %190 = vector.broadcast %cst_70 : f32 to vector<2x16xf32>
    %191 = vector.broadcast %cst_71 : f32 to vector<2x16xf32>
    %192 = arith.select %188, %190, %191 : vector<2x16xi1>, vector<2x16xf32>
    %cst_72 = arith.constant dense<0.000000e+00> : vector<2x16xf32>
    %193 = tpu.matmul %192, %52, %cst_72 {dimension_numbers = #tpu.dot_dimension_numbers<[1], [0], [0], [1], [0, 0, 1, 1], [], []>} : vector<2x16xf32>, vector<16x16xf32>, vector<2x16xf32> -> vector<2x16xf32>
    %cst_73 = arith.constant dense<0.000000e+00> : vector<2x16xf32>
    %194 = tpu.matmul %192, %71, %cst_73 {dimension_numbers = #tpu.dot_dimension_numbers<[1], [0], [0], [1], [0, 0, 1, 1], [], []>} : vector<2x16xf32>, vector<16x16xf32>, vector<2x16xf32> -> vector<2x16xf32>
    %195 = arith.select %91, %193, %194 : vector<2x16xi1>, vector<2x16xf32>
    %196 = arith.select %91, %194, %193 : vector<2x16xi1>, vector<2x16xf32>
    %197 = arith.cmpf olt, %195, %177 : vector<2x16xf32>
    %cst_74 = arith.constant dense<true> : vector<2x16xi1>
    %198 = arith.xori %189, %cst_74 : vector<2x16xi1>
    %199 = arith.andi %197, %198 : vector<2x16xi1>
    %200 = arith.select %199, %195, %177 : vector<2x16xi1>, vector<2x16xf32>
    %201 = arith.select %199, %196, %178 : vector<2x16xi1>, vector<2x16xf32>
    %cst_75 = arith.constant 1.000000e+30 : f32
    %202 = vector.broadcast %cst_75 : f32 to vector<2x16xf32>
    %203 = arith.select %189, %202, %200 : vector<2x16xi1>, vector<2x16xf32>
    %204 = tpu.bitcast %203 : vector<2x16xf32> -> vector<2x16xi32>
    %c-16_i32_76 = arith.constant -16 : i32
    %205 = vector.broadcast %c-16_i32_76 : i32 to vector<2x16xi32>
    %206 = arith.andi %204, %205 : vector<2x16xi32>
    %207 = arith.ori %206, %88 : vector<2x16xi32>
    %cst_77 = arith.constant dense<2147483647> : vector<2xi32>
    %208 = vector.multi_reduction <minsi>, %207, %cst_77 [1] : vector<2x16xi32> to vector<2xi32>
    %209 = vector.shape_cast %208 : vector<2xi32> to vector<2x1xi32>
    %210 = vector.broadcast %209 : vector<2x1xi32> to vector<2x16xi32>
    %211 = arith.cmpi eq, %207, %210 : vector<2x16xi32>
    %212 = arith.ori %189, %211 : vector<2x16xi1>
    %cst_78 = arith.constant 1.000000e+00 : f32
    %cst_79 = arith.constant 0.000000e+00 : f32
    %213 = vector.broadcast %cst_78 : f32 to vector<2x16xf32>
    %214 = vector.broadcast %cst_79 : f32 to vector<2x16xf32>
    %215 = arith.select %211, %213, %214 : vector<2x16xi1>, vector<2x16xf32>
    %cst_80 = arith.constant dense<0.000000e+00> : vector<2x16xf32>
    %216 = tpu.matmul %215, %52, %cst_80 {dimension_numbers = #tpu.dot_dimension_numbers<[1], [0], [0], [1], [0, 0, 1, 1], [], []>} : vector<2x16xf32>, vector<16x16xf32>, vector<2x16xf32> -> vector<2x16xf32>
    %cst_81 = arith.constant dense<0.000000e+00> : vector<2x16xf32>
    %217 = tpu.matmul %215, %71, %cst_81 {dimension_numbers = #tpu.dot_dimension_numbers<[1], [0], [0], [1], [0, 0, 1, 1], [], []>} : vector<2x16xf32>, vector<16x16xf32>, vector<2x16xf32> -> vector<2x16xf32>
    %218 = arith.select %91, %216, %217 : vector<2x16xi1>, vector<2x16xf32>
    %219 = arith.select %91, %217, %216 : vector<2x16xi1>, vector<2x16xf32>
    %220 = arith.cmpf olt, %218, %200 : vector<2x16xf32>
    %cst_82 = arith.constant dense<true> : vector<2x16xi1>
    %221 = arith.xori %212, %cst_82 : vector<2x16xi1>
    %222 = arith.andi %220, %221 : vector<2x16xi1>
    %223 = arith.select %222, %218, %200 : vector<2x16xi1>, vector<2x16xf32>
    %224 = arith.select %222, %219, %201 : vector<2x16xi1>, vector<2x16xf32>
    %cst_83 = arith.constant 1.000000e+30 : f32
    %225 = vector.broadcast %cst_83 : f32 to vector<2x16xf32>
    %226 = arith.select %212, %225, %223 : vector<2x16xi1>, vector<2x16xf32>
    %227 = tpu.bitcast %226 : vector<2x16xf32> -> vector<2x16xi32>
    %c-16_i32_84 = arith.constant -16 : i32
    %228 = vector.broadcast %c-16_i32_84 : i32 to vector<2x16xi32>
    %229 = arith.andi %227, %228 : vector<2x16xi32>
    %230 = arith.ori %229, %88 : vector<2x16xi32>
    %cst_85 = arith.constant dense<2147483647> : vector<2xi32>
    %231 = vector.multi_reduction <minsi>, %230, %cst_85 [1] : vector<2x16xi32> to vector<2xi32>
    %232 = vector.shape_cast %231 : vector<2xi32> to vector<2x1xi32>
    %233 = vector.broadcast %232 : vector<2x1xi32> to vector<2x16xi32>
    %234 = arith.cmpi eq, %230, %233 : vector<2x16xi32>
    %235 = arith.ori %212, %234 : vector<2x16xi1>
    %cst_86 = arith.constant 1.000000e+00 : f32
    %cst_87 = arith.constant 0.000000e+00 : f32
    %236 = vector.broadcast %cst_86 : f32 to vector<2x16xf32>
    %237 = vector.broadcast %cst_87 : f32 to vector<2x16xf32>
    %238 = arith.select %234, %236, %237 : vector<2x16xi1>, vector<2x16xf32>
    %cst_88 = arith.constant dense<0.000000e+00> : vector<2x16xf32>
    %239 = tpu.matmul %238, %52, %cst_88 {dimension_numbers = #tpu.dot_dimension_numbers<[1], [0], [0], [1], [0, 0, 1, 1], [], []>} : vector<2x16xf32>, vector<16x16xf32>, vector<2x16xf32> -> vector<2x16xf32>
    %cst_89 = arith.constant dense<0.000000e+00> : vector<2x16xf32>
    %240 = tpu.matmul %238, %71, %cst_89 {dimension_numbers = #tpu.dot_dimension_numbers<[1], [0], [0], [1], [0, 0, 1, 1], [], []>} : vector<2x16xf32>, vector<16x16xf32>, vector<2x16xf32> -> vector<2x16xf32>
    %241 = arith.select %91, %239, %240 : vector<2x16xi1>, vector<2x16xf32>
    %242 = arith.select %91, %240, %239 : vector<2x16xi1>, vector<2x16xf32>
    %243 = arith.cmpf olt, %241, %223 : vector<2x16xf32>
    %cst_90 = arith.constant dense<true> : vector<2x16xi1>
    %244 = arith.xori %235, %cst_90 : vector<2x16xi1>
    %245 = arith.andi %243, %244 : vector<2x16xi1>
    %246 = arith.select %245, %241, %223 : vector<2x16xi1>, vector<2x16xf32>
    %247 = arith.select %245, %242, %224 : vector<2x16xi1>, vector<2x16xf32>
    %cst_91 = arith.constant 1.000000e+30 : f32
    %248 = vector.broadcast %cst_91 : f32 to vector<2x16xf32>
    %249 = arith.select %235, %248, %246 : vector<2x16xi1>, vector<2x16xf32>
    %250 = tpu.bitcast %249 : vector<2x16xf32> -> vector<2x16xi32>
    %c-16_i32_92 = arith.constant -16 : i32
    %251 = vector.broadcast %c-16_i32_92 : i32 to vector<2x16xi32>
    %252 = arith.andi %250, %251 : vector<2x16xi32>
    %253 = arith.ori %252, %88 : vector<2x16xi32>
    %cst_93 = arith.constant dense<2147483647> : vector<2xi32>
    %254 = vector.multi_reduction <minsi>, %253, %cst_93 [1] : vector<2x16xi32> to vector<2xi32>
    %255 = vector.shape_cast %254 : vector<2xi32> to vector<2x1xi32>
    %256 = vector.broadcast %255 : vector<2x1xi32> to vector<2x16xi32>
    %257 = arith.cmpi eq, %253, %256 : vector<2x16xi32>
    %258 = arith.ori %235, %257 : vector<2x16xi1>
    %cst_94 = arith.constant 1.000000e+00 : f32
    %cst_95 = arith.constant 0.000000e+00 : f32
    %259 = vector.broadcast %cst_94 : f32 to vector<2x16xf32>
    %260 = vector.broadcast %cst_95 : f32 to vector<2x16xf32>
    %261 = arith.select %257, %259, %260 : vector<2x16xi1>, vector<2x16xf32>
    %cst_96 = arith.constant dense<0.000000e+00> : vector<2x16xf32>
    %262 = tpu.matmul %261, %52, %cst_96 {dimension_numbers = #tpu.dot_dimension_numbers<[1], [0], [0], [1], [0, 0, 1, 1], [], []>} : vector<2x16xf32>, vector<16x16xf32>, vector<2x16xf32> -> vector<2x16xf32>
    %cst_97 = arith.constant dense<0.000000e+00> : vector<2x16xf32>
    %263 = tpu.matmul %261, %71, %cst_97 {dimension_numbers = #tpu.dot_dimension_numbers<[1], [0], [0], [1], [0, 0, 1, 1], [], []>} : vector<2x16xf32>, vector<16x16xf32>, vector<2x16xf32> -> vector<2x16xf32>
    %264 = arith.select %91, %262, %263 : vector<2x16xi1>, vector<2x16xf32>
    %265 = arith.select %91, %263, %262 : vector<2x16xi1>, vector<2x16xf32>
    %266 = arith.cmpf olt, %264, %246 : vector<2x16xf32>
    %cst_98 = arith.constant dense<true> : vector<2x16xi1>
    %267 = arith.xori %258, %cst_98 : vector<2x16xi1>
    %268 = arith.andi %266, %267 : vector<2x16xi1>
    %269 = arith.select %268, %264, %246 : vector<2x16xi1>, vector<2x16xf32>
    %270 = arith.select %268, %265, %247 : vector<2x16xi1>, vector<2x16xf32>
    %cst_99 = arith.constant 1.000000e+30 : f32
    %271 = vector.broadcast %cst_99 : f32 to vector<2x16xf32>
    %272 = arith.select %258, %271, %269 : vector<2x16xi1>, vector<2x16xf32>
    %273 = tpu.bitcast %272 : vector<2x16xf32> -> vector<2x16xi32>
    %c-16_i32_100 = arith.constant -16 : i32
    %274 = vector.broadcast %c-16_i32_100 : i32 to vector<2x16xi32>
    %275 = arith.andi %273, %274 : vector<2x16xi32>
    %276 = arith.ori %275, %88 : vector<2x16xi32>
    %cst_101 = arith.constant dense<2147483647> : vector<2xi32>
    %277 = vector.multi_reduction <minsi>, %276, %cst_101 [1] : vector<2x16xi32> to vector<2xi32>
    %278 = vector.shape_cast %277 : vector<2xi32> to vector<2x1xi32>
    %279 = vector.broadcast %278 : vector<2x1xi32> to vector<2x16xi32>
    %280 = arith.cmpi eq, %276, %279 : vector<2x16xi32>
    %281 = arith.ori %258, %280 : vector<2x16xi1>
    %cst_102 = arith.constant 1.000000e+00 : f32
    %cst_103 = arith.constant 0.000000e+00 : f32
    %282 = vector.broadcast %cst_102 : f32 to vector<2x16xf32>
    %283 = vector.broadcast %cst_103 : f32 to vector<2x16xf32>
    %284 = arith.select %280, %282, %283 : vector<2x16xi1>, vector<2x16xf32>
    %cst_104 = arith.constant dense<0.000000e+00> : vector<2x16xf32>
    %285 = tpu.matmul %284, %52, %cst_104 {dimension_numbers = #tpu.dot_dimension_numbers<[1], [0], [0], [1], [0, 0, 1, 1], [], []>} : vector<2x16xf32>, vector<16x16xf32>, vector<2x16xf32> -> vector<2x16xf32>
    %cst_105 = arith.constant dense<0.000000e+00> : vector<2x16xf32>
    %286 = tpu.matmul %284, %71, %cst_105 {dimension_numbers = #tpu.dot_dimension_numbers<[1], [0], [0], [1], [0, 0, 1, 1], [], []>} : vector<2x16xf32>, vector<16x16xf32>, vector<2x16xf32> -> vector<2x16xf32>
    %287 = arith.select %91, %285, %286 : vector<2x16xi1>, vector<2x16xf32>
    %288 = arith.select %91, %286, %285 : vector<2x16xi1>, vector<2x16xf32>
    %289 = arith.cmpf olt, %287, %269 : vector<2x16xf32>
    %cst_106 = arith.constant dense<true> : vector<2x16xi1>
    %290 = arith.xori %281, %cst_106 : vector<2x16xi1>
    %291 = arith.andi %289, %290 : vector<2x16xi1>
    %292 = arith.select %291, %287, %269 : vector<2x16xi1>, vector<2x16xf32>
    %293 = arith.select %291, %288, %270 : vector<2x16xi1>, vector<2x16xf32>
    %cst_107 = arith.constant 1.000000e+30 : f32
    %294 = vector.broadcast %cst_107 : f32 to vector<2x16xf32>
    %295 = arith.select %281, %294, %292 : vector<2x16xi1>, vector<2x16xf32>
    %296 = tpu.bitcast %295 : vector<2x16xf32> -> vector<2x16xi32>
    %c-16_i32_108 = arith.constant -16 : i32
    %297 = vector.broadcast %c-16_i32_108 : i32 to vector<2x16xi32>
    %298 = arith.andi %296, %297 : vector<2x16xi32>
    %299 = arith.ori %298, %88 : vector<2x16xi32>
    %cst_109 = arith.constant dense<2147483647> : vector<2xi32>
    %300 = vector.multi_reduction <minsi>, %299, %cst_109 [1] : vector<2x16xi32> to vector<2xi32>
    %301 = vector.shape_cast %300 : vector<2xi32> to vector<2x1xi32>
    %302 = vector.broadcast %301 : vector<2x1xi32> to vector<2x16xi32>
    %303 = arith.cmpi eq, %299, %302 : vector<2x16xi32>
    %304 = arith.ori %281, %303 : vector<2x16xi1>
    %cst_110 = arith.constant 1.000000e+00 : f32
    %cst_111 = arith.constant 0.000000e+00 : f32
    %305 = vector.broadcast %cst_110 : f32 to vector<2x16xf32>
    %306 = vector.broadcast %cst_111 : f32 to vector<2x16xf32>
    %307 = arith.select %303, %305, %306 : vector<2x16xi1>, vector<2x16xf32>
    %cst_112 = arith.constant dense<0.000000e+00> : vector<2x16xf32>
    %308 = tpu.matmul %307, %52, %cst_112 {dimension_numbers = #tpu.dot_dimension_numbers<[1], [0], [0], [1], [0, 0, 1, 1], [], []>} : vector<2x16xf32>, vector<16x16xf32>, vector<2x16xf32> -> vector<2x16xf32>
    %cst_113 = arith.constant dense<0.000000e+00> : vector<2x16xf32>
    %309 = tpu.matmul %307, %71, %cst_113 {dimension_numbers = #tpu.dot_dimension_numbers<[1], [0], [0], [1], [0, 0, 1, 1], [], []>} : vector<2x16xf32>, vector<16x16xf32>, vector<2x16xf32> -> vector<2x16xf32>
    %310 = arith.select %91, %308, %309 : vector<2x16xi1>, vector<2x16xf32>
    %311 = arith.select %91, %309, %308 : vector<2x16xi1>, vector<2x16xf32>
    %312 = arith.cmpf olt, %310, %292 : vector<2x16xf32>
    %cst_114 = arith.constant dense<true> : vector<2x16xi1>
    %313 = arith.xori %304, %cst_114 : vector<2x16xi1>
    %314 = arith.andi %312, %313 : vector<2x16xi1>
    %315 = arith.select %314, %310, %292 : vector<2x16xi1>, vector<2x16xf32>
    %316 = arith.select %314, %311, %293 : vector<2x16xi1>, vector<2x16xf32>
    %cst_115 = arith.constant 1.000000e+30 : f32
    %317 = vector.broadcast %cst_115 : f32 to vector<2x16xf32>
    %318 = arith.select %304, %317, %315 : vector<2x16xi1>, vector<2x16xf32>
    %319 = tpu.bitcast %318 : vector<2x16xf32> -> vector<2x16xi32>
    %c-16_i32_116 = arith.constant -16 : i32
    %320 = vector.broadcast %c-16_i32_116 : i32 to vector<2x16xi32>
    %321 = arith.andi %319, %320 : vector<2x16xi32>
    %322 = arith.ori %321, %88 : vector<2x16xi32>
    %cst_117 = arith.constant dense<2147483647> : vector<2xi32>
    %323 = vector.multi_reduction <minsi>, %322, %cst_117 [1] : vector<2x16xi32> to vector<2xi32>
    %324 = vector.shape_cast %323 : vector<2xi32> to vector<2x1xi32>
    %325 = vector.broadcast %324 : vector<2x1xi32> to vector<2x16xi32>
    %326 = arith.cmpi eq, %322, %325 : vector<2x16xi32>
    %327 = arith.ori %304, %326 : vector<2x16xi1>
    %cst_118 = arith.constant 1.000000e+00 : f32
    %cst_119 = arith.constant 0.000000e+00 : f32
    %328 = vector.broadcast %cst_118 : f32 to vector<2x16xf32>
    %329 = vector.broadcast %cst_119 : f32 to vector<2x16xf32>
    %330 = arith.select %326, %328, %329 : vector<2x16xi1>, vector<2x16xf32>
    %cst_120 = arith.constant dense<0.000000e+00> : vector<2x16xf32>
    %331 = tpu.matmul %330, %52, %cst_120 {dimension_numbers = #tpu.dot_dimension_numbers<[1], [0], [0], [1], [0, 0, 1, 1], [], []>} : vector<2x16xf32>, vector<16x16xf32>, vector<2x16xf32> -> vector<2x16xf32>
    %cst_121 = arith.constant dense<0.000000e+00> : vector<2x16xf32>
    %332 = tpu.matmul %330, %71, %cst_121 {dimension_numbers = #tpu.dot_dimension_numbers<[1], [0], [0], [1], [0, 0, 1, 1], [], []>} : vector<2x16xf32>, vector<16x16xf32>, vector<2x16xf32> -> vector<2x16xf32>
    %333 = arith.select %91, %331, %332 : vector<2x16xi1>, vector<2x16xf32>
    %334 = arith.select %91, %332, %331 : vector<2x16xi1>, vector<2x16xf32>
    %335 = arith.cmpf olt, %333, %315 : vector<2x16xf32>
    %cst_122 = arith.constant dense<true> : vector<2x16xi1>
    %336 = arith.xori %327, %cst_122 : vector<2x16xi1>
    %337 = arith.andi %335, %336 : vector<2x16xi1>
    %338 = arith.select %337, %333, %315 : vector<2x16xi1>, vector<2x16xf32>
    %339 = arith.select %337, %334, %316 : vector<2x16xi1>, vector<2x16xf32>
    %cst_123 = arith.constant 1.000000e+30 : f32
    %340 = vector.broadcast %cst_123 : f32 to vector<2x16xf32>
    %341 = arith.select %327, %340, %338 : vector<2x16xi1>, vector<2x16xf32>
    %342 = tpu.bitcast %341 : vector<2x16xf32> -> vector<2x16xi32>
    %c-16_i32_124 = arith.constant -16 : i32
    %343 = vector.broadcast %c-16_i32_124 : i32 to vector<2x16xi32>
    %344 = arith.andi %342, %343 : vector<2x16xi32>
    %345 = arith.ori %344, %88 : vector<2x16xi32>
    %cst_125 = arith.constant dense<2147483647> : vector<2xi32>
    %346 = vector.multi_reduction <minsi>, %345, %cst_125 [1] : vector<2x16xi32> to vector<2xi32>
    %347 = vector.shape_cast %346 : vector<2xi32> to vector<2x1xi32>
    %348 = vector.broadcast %347 : vector<2x1xi32> to vector<2x16xi32>
    %349 = arith.cmpi eq, %345, %348 : vector<2x16xi32>
    %350 = arith.ori %327, %349 : vector<2x16xi1>
    %cst_126 = arith.constant 1.000000e+00 : f32
    %cst_127 = arith.constant 0.000000e+00 : f32
    %351 = vector.broadcast %cst_126 : f32 to vector<2x16xf32>
    %352 = vector.broadcast %cst_127 : f32 to vector<2x16xf32>
    %353 = arith.select %349, %351, %352 : vector<2x16xi1>, vector<2x16xf32>
    %cst_128 = arith.constant dense<0.000000e+00> : vector<2x16xf32>
    %354 = tpu.matmul %353, %52, %cst_128 {dimension_numbers = #tpu.dot_dimension_numbers<[1], [0], [0], [1], [0, 0, 1, 1], [], []>} : vector<2x16xf32>, vector<16x16xf32>, vector<2x16xf32> -> vector<2x16xf32>
    %cst_129 = arith.constant dense<0.000000e+00> : vector<2x16xf32>
    %355 = tpu.matmul %353, %71, %cst_129 {dimension_numbers = #tpu.dot_dimension_numbers<[1], [0], [0], [1], [0, 0, 1, 1], [], []>} : vector<2x16xf32>, vector<16x16xf32>, vector<2x16xf32> -> vector<2x16xf32>
    %356 = arith.select %91, %354, %355 : vector<2x16xi1>, vector<2x16xf32>
    %357 = arith.select %91, %355, %354 : vector<2x16xi1>, vector<2x16xf32>
    %358 = arith.cmpf olt, %356, %338 : vector<2x16xf32>
    %cst_130 = arith.constant dense<true> : vector<2x16xi1>
    %359 = arith.xori %350, %cst_130 : vector<2x16xi1>
    %360 = arith.andi %358, %359 : vector<2x16xi1>
    %361 = arith.select %360, %356, %338 : vector<2x16xi1>, vector<2x16xf32>
    %362 = arith.select %360, %357, %339 : vector<2x16xi1>, vector<2x16xf32>
    %cst_131 = arith.constant 1.000000e+30 : f32
    %363 = vector.broadcast %cst_131 : f32 to vector<2x16xf32>
    %364 = arith.select %350, %363, %361 : vector<2x16xi1>, vector<2x16xf32>
    %365 = tpu.bitcast %364 : vector<2x16xf32> -> vector<2x16xi32>
    %c-16_i32_132 = arith.constant -16 : i32
    %366 = vector.broadcast %c-16_i32_132 : i32 to vector<2x16xi32>
    %367 = arith.andi %365, %366 : vector<2x16xi32>
    %368 = arith.ori %367, %88 : vector<2x16xi32>
    %cst_133 = arith.constant dense<2147483647> : vector<2xi32>
    %369 = vector.multi_reduction <minsi>, %368, %cst_133 [1] : vector<2x16xi32> to vector<2xi32>
    %370 = vector.shape_cast %369 : vector<2xi32> to vector<2x1xi32>
    %371 = vector.broadcast %370 : vector<2x1xi32> to vector<2x16xi32>
    %372 = arith.cmpi eq, %368, %371 : vector<2x16xi32>
    %373 = arith.ori %350, %372 : vector<2x16xi1>
    %cst_134 = arith.constant 1.000000e+00 : f32
    %cst_135 = arith.constant 0.000000e+00 : f32
    %374 = vector.broadcast %cst_134 : f32 to vector<2x16xf32>
    %375 = vector.broadcast %cst_135 : f32 to vector<2x16xf32>
    %376 = arith.select %372, %374, %375 : vector<2x16xi1>, vector<2x16xf32>
    %cst_136 = arith.constant dense<0.000000e+00> : vector<2x16xf32>
    %377 = tpu.matmul %376, %52, %cst_136 {dimension_numbers = #tpu.dot_dimension_numbers<[1], [0], [0], [1], [0, 0, 1, 1], [], []>} : vector<2x16xf32>, vector<16x16xf32>, vector<2x16xf32> -> vector<2x16xf32>
    %cst_137 = arith.constant dense<0.000000e+00> : vector<2x16xf32>
    %378 = tpu.matmul %376, %71, %cst_137 {dimension_numbers = #tpu.dot_dimension_numbers<[1], [0], [0], [1], [0, 0, 1, 1], [], []>} : vector<2x16xf32>, vector<16x16xf32>, vector<2x16xf32> -> vector<2x16xf32>
    %379 = arith.select %91, %377, %378 : vector<2x16xi1>, vector<2x16xf32>
    %380 = arith.select %91, %378, %377 : vector<2x16xi1>, vector<2x16xf32>
    %381 = arith.cmpf olt, %379, %361 : vector<2x16xf32>
    %cst_138 = arith.constant dense<true> : vector<2x16xi1>
    %382 = arith.xori %373, %cst_138 : vector<2x16xi1>
    %383 = arith.andi %381, %382 : vector<2x16xi1>
    %384 = arith.select %383, %379, %361 : vector<2x16xi1>, vector<2x16xf32>
    %385 = arith.select %383, %380, %362 : vector<2x16xi1>, vector<2x16xf32>
    %cst_139 = arith.constant 1.000000e+30 : f32
    %386 = vector.broadcast %cst_139 : f32 to vector<2x16xf32>
    %387 = arith.select %373, %386, %384 : vector<2x16xi1>, vector<2x16xf32>
    %388 = tpu.bitcast %387 : vector<2x16xf32> -> vector<2x16xi32>
    %c-16_i32_140 = arith.constant -16 : i32
    %389 = vector.broadcast %c-16_i32_140 : i32 to vector<2x16xi32>
    %390 = arith.andi %388, %389 : vector<2x16xi32>
    %391 = arith.ori %390, %88 : vector<2x16xi32>
    %cst_141 = arith.constant dense<2147483647> : vector<2xi32>
    %392 = vector.multi_reduction <minsi>, %391, %cst_141 [1] : vector<2x16xi32> to vector<2xi32>
    %393 = vector.shape_cast %392 : vector<2xi32> to vector<2x1xi32>
    %394 = vector.broadcast %393 : vector<2x1xi32> to vector<2x16xi32>
    %395 = arith.cmpi eq, %391, %394 : vector<2x16xi32>
    %396 = arith.ori %373, %395 : vector<2x16xi1>
    %cst_142 = arith.constant 1.000000e+00 : f32
    %cst_143 = arith.constant 0.000000e+00 : f32
    %397 = vector.broadcast %cst_142 : f32 to vector<2x16xf32>
    %398 = vector.broadcast %cst_143 : f32 to vector<2x16xf32>
    %399 = arith.select %395, %397, %398 : vector<2x16xi1>, vector<2x16xf32>
    %cst_144 = arith.constant dense<0.000000e+00> : vector<2x16xf32>
    %400 = tpu.matmul %399, %52, %cst_144 {dimension_numbers = #tpu.dot_dimension_numbers<[1], [0], [0], [1], [0, 0, 1, 1], [], []>} : vector<2x16xf32>, vector<16x16xf32>, vector<2x16xf32> -> vector<2x16xf32>
    %cst_145 = arith.constant dense<0.000000e+00> : vector<2x16xf32>
    %401 = tpu.matmul %399, %71, %cst_145 {dimension_numbers = #tpu.dot_dimension_numbers<[1], [0], [0], [1], [0, 0, 1, 1], [], []>} : vector<2x16xf32>, vector<16x16xf32>, vector<2x16xf32> -> vector<2x16xf32>
    %402 = arith.select %91, %400, %401 : vector<2x16xi1>, vector<2x16xf32>
    %403 = arith.select %91, %401, %400 : vector<2x16xi1>, vector<2x16xf32>
    %404 = arith.cmpf olt, %402, %384 : vector<2x16xf32>
    %cst_146 = arith.constant dense<true> : vector<2x16xi1>
    %405 = arith.xori %396, %cst_146 : vector<2x16xi1>
    %406 = arith.andi %404, %405 : vector<2x16xi1>
    %407 = arith.select %406, %402, %384 : vector<2x16xi1>, vector<2x16xf32>
    %408 = arith.select %406, %403, %385 : vector<2x16xi1>, vector<2x16xf32>
    %cst_147 = arith.constant 1.000000e+30 : f32
    %409 = vector.broadcast %cst_147 : f32 to vector<2x16xf32>
    %410 = arith.select %396, %409, %407 : vector<2x16xi1>, vector<2x16xf32>
    %411 = tpu.bitcast %410 : vector<2x16xf32> -> vector<2x16xi32>
    %c-16_i32_148 = arith.constant -16 : i32
    %412 = vector.broadcast %c-16_i32_148 : i32 to vector<2x16xi32>
    %413 = arith.andi %411, %412 : vector<2x16xi32>
    %414 = arith.ori %413, %88 : vector<2x16xi32>
    %cst_149 = arith.constant dense<2147483647> : vector<2xi32>
    %415 = vector.multi_reduction <minsi>, %414, %cst_149 [1] : vector<2x16xi32> to vector<2xi32>
    %416 = vector.shape_cast %415 : vector<2xi32> to vector<2x1xi32>
    %417 = vector.broadcast %416 : vector<2x1xi32> to vector<2x16xi32>
    %418 = arith.cmpi eq, %414, %417 : vector<2x16xi32>
    %419 = arith.ori %396, %418 : vector<2x16xi1>
    %cst_150 = arith.constant 1.000000e+00 : f32
    %cst_151 = arith.constant 0.000000e+00 : f32
    %420 = vector.broadcast %cst_150 : f32 to vector<2x16xf32>
    %421 = vector.broadcast %cst_151 : f32 to vector<2x16xf32>
    %422 = arith.select %418, %420, %421 : vector<2x16xi1>, vector<2x16xf32>
    %cst_152 = arith.constant dense<0.000000e+00> : vector<2x16xf32>
    %423 = tpu.matmul %422, %52, %cst_152 {dimension_numbers = #tpu.dot_dimension_numbers<[1], [0], [0], [1], [0, 0, 1, 1], [], []>} : vector<2x16xf32>, vector<16x16xf32>, vector<2x16xf32> -> vector<2x16xf32>
    %cst_153 = arith.constant dense<0.000000e+00> : vector<2x16xf32>
    %424 = tpu.matmul %422, %71, %cst_153 {dimension_numbers = #tpu.dot_dimension_numbers<[1], [0], [0], [1], [0, 0, 1, 1], [], []>} : vector<2x16xf32>, vector<16x16xf32>, vector<2x16xf32> -> vector<2x16xf32>
    %425 = arith.select %91, %423, %424 : vector<2x16xi1>, vector<2x16xf32>
    %426 = arith.select %91, %424, %423 : vector<2x16xi1>, vector<2x16xf32>
    %427 = arith.cmpf olt, %425, %407 : vector<2x16xf32>
    %cst_154 = arith.constant dense<true> : vector<2x16xi1>
    %428 = arith.xori %419, %cst_154 : vector<2x16xi1>
    %429 = arith.andi %427, %428 : vector<2x16xi1>
    %430 = arith.select %429, %425, %407 : vector<2x16xi1>, vector<2x16xf32>
    %431 = arith.select %429, %426, %408 : vector<2x16xi1>, vector<2x16xf32>
    %cst_155 = arith.constant 1.000000e+30 : f32
    %432 = vector.broadcast %cst_155 : f32 to vector<2x16xf32>
    %433 = arith.select %419, %432, %430 : vector<2x16xi1>, vector<2x16xf32>
    %434 = tpu.bitcast %433 : vector<2x16xf32> -> vector<2x16xi32>
    %c-16_i32_156 = arith.constant -16 : i32
    %435 = vector.broadcast %c-16_i32_156 : i32 to vector<2x16xi32>
    %436 = arith.andi %434, %435 : vector<2x16xi32>
    %437 = arith.ori %436, %88 : vector<2x16xi32>
    %cst_157 = arith.constant dense<2147483647> : vector<2xi32>
    %438 = vector.multi_reduction <minsi>, %437, %cst_157 [1] : vector<2x16xi32> to vector<2xi32>
    %439 = vector.shape_cast %438 : vector<2xi32> to vector<2x1xi32>
    %440 = vector.broadcast %439 : vector<2x1xi32> to vector<2x16xi32>
    %441 = arith.cmpi eq, %437, %440 : vector<2x16xi32>
    %442 = arith.ori %419, %441 : vector<2x16xi1>
    %cst_158 = arith.constant 1.000000e+00 : f32
    %cst_159 = arith.constant 0.000000e+00 : f32
    %443 = vector.broadcast %cst_158 : f32 to vector<2x16xf32>
    %444 = vector.broadcast %cst_159 : f32 to vector<2x16xf32>
    %445 = arith.select %441, %443, %444 : vector<2x16xi1>, vector<2x16xf32>
    %cst_160 = arith.constant dense<0.000000e+00> : vector<2x16xf32>
    %446 = tpu.matmul %445, %52, %cst_160 {dimension_numbers = #tpu.dot_dimension_numbers<[1], [0], [0], [1], [0, 0, 1, 1], [], []>} : vector<2x16xf32>, vector<16x16xf32>, vector<2x16xf32> -> vector<2x16xf32>
    %cst_161 = arith.constant dense<0.000000e+00> : vector<2x16xf32>
    %447 = tpu.matmul %445, %71, %cst_161 {dimension_numbers = #tpu.dot_dimension_numbers<[1], [0], [0], [1], [0, 0, 1, 1], [], []>} : vector<2x16xf32>, vector<16x16xf32>, vector<2x16xf32> -> vector<2x16xf32>
    %448 = arith.select %91, %446, %447 : vector<2x16xi1>, vector<2x16xf32>
    %449 = arith.select %91, %447, %446 : vector<2x16xi1>, vector<2x16xf32>
    %450 = arith.cmpf olt, %448, %430 : vector<2x16xf32>
    %cst_162 = arith.constant dense<true> : vector<2x16xi1>
    %451 = arith.xori %442, %cst_162 : vector<2x16xi1>
    %452 = arith.andi %450, %451 : vector<2x16xi1>
    %453 = arith.select %452, %448, %430 : vector<2x16xi1>, vector<2x16xf32>
    %454 = arith.select %452, %449, %431 : vector<2x16xi1>, vector<2x16xf32>
    %c0_i32_163 = arith.constant 0 : i32
    %455 = vector.broadcast %c0_i32_163 : i32 to vector<2x16xi32>
    %456 = arith.cmpi sgt, %88, %455 : vector<2x16xi32>
    %cst_164 = arith.constant 0.000000e+00 : f32
    %457 = vector.broadcast %cst_164 : f32 to vector<2x16xf32>
    %458 = arith.select %456, %453, %457 : vector<2x16xi1>, vector<2x16xf32>
    %cst_165 = arith.constant 1.000000e+00 : f32
    %459 = vector.broadcast %cst_165 : f32 to vector<2x16xf32>
    %460 = arith.cmpf ogt, %458, %459 : vector<2x16xf32>
    %461 = vector.shape_cast %79 : vector<1x1xf32> to vector<1x1xf32>
    %462 = vector.broadcast %461 : vector<1x1xf32> to vector<2x16xf32>
    %463 = vector.shape_cast %87 : vector<1x1xf32> to vector<1x1xf32>
    %464 = vector.broadcast %463 : vector<1x1xf32> to vector<2x16xf32>
    %465 = arith.select %91, %462, %464 : vector<2x16xi1>, vector<2x16xf32>
    %466 = vector.shape_cast %87 : vector<1x1xf32> to vector<1x1xf32>
    %467 = vector.broadcast %466 : vector<1x1xf32> to vector<2x16xf32>
    %468 = vector.shape_cast %79 : vector<1x1xf32> to vector<1x1xf32>
    %469 = vector.broadcast %468 : vector<1x1xf32> to vector<2x16xf32>
    %470 = arith.select %91, %467, %469 : vector<2x16xi1>, vector<2x16xf32>
    %471 = arith.mulf %458, %465 : vector<2x16xf32>
    %472 = arith.mulf %454, %470 : vector<2x16xf32>
    %473 = arith.subf %471, %472 : vector<2x16xf32>
    %474 = arith.mulf %473, %473 : vector<2x16xf32>
    %cst_166 = arith.constant 0.000000e+00 : f32
    %475 = vector.broadcast %cst_166 : f32 to vector<2x16xf32>
    %476 = arith.select %460, %474, %475 : vector<2x16xi1>, vector<2x16xf32>
    %cst_167 = arith.constant dense<0.000000e+00> : vector<2xf32>
    %477 = vector.multi_reduction <add>, %476, %cst_167 [1] : vector<2x16xf32> to vector<2xf32>
    %478 = vector.shape_cast %477 : vector<2xf32> to vector<2x1xf32>
    %cst_168 = arith.constant dense<0.000000e+00> : vector<1xf32>
    %479 = vector.multi_reduction <add>, %478, %cst_168 [0] : vector<2x1xf32> to vector<1xf32>
    %480 = vector.shape_cast %479 : vector<1xf32> to vector<1x1xf32>
    %cst_169 = arith.constant 5.000000e-01 : f32
    %481 = vector.broadcast %cst_169 : f32 to vector<1x1xf32>
    %482 = arith.mulf %481, %480 : vector<1x1xf32>
    %cst_170 = arith.constant 1.000000e+00 : f32
    %483 = vector.broadcast %cst_170 : f32 to vector<1x1xf32>
    %484 = arith.mulf %483, %482 : vector<1x1xf32>
    %485 = arith.addf %33, %484 : vector<1x1xf32>
    %c0_171 = arith.constant 0 : index
    %c0_172 = arith.constant 0 : index
    %486 = vector.load %arg2[%c0_171, %c0_172] : memref<1x1xf32, #tpu.memory_space<vmem>>, vector<1x1xf32>
    tpu.vector_store %arg2[%c0_171, %c0_172], %485 {strides = array<i32>} : memref<1x1xf32, #tpu.memory_space<vmem>>, vector<1x1xf32>,
    return
  }
}

</mosaic_0001>

<bundles_post_ra>
// kernel: topological_autoencoder_loss.1
= control target key start
LH: loop header
LB: loop body
LE: loop exit
PB: predicated region body
PF: predicated region fallthrough
CT: control target
= control target key end

     0   :  { %vm35_vm0 = vcmask 261120   ;;  %s4717_s0 = inlined_call_operand.vmem [shape: f32[16,32], index: 0, kind: input, shape index: {}]   ;;  %s4718_s1 = inlined_call_operand.vmem [shape: f32[136,32], index: 1, kind: input, shape index: {}]   ;;  %s4719_s2 = inlined_call_operand.hbm [shape: f32[1,1], index: 2, kind: output, shape index: {}]  }
   0x1   :  { %v17_v0 = vld [vmem:[%s4718_s1 + $0x18] sm:$0xff]  ;;  %v16_v1 = vld [vmem:[%s4718_s1 + $0x10] sm:$0xff]  ;;  %v3957_v2 = vld [vmem:[%s4717_s0] sm:$0xff] }
   0x2   :  { %3607 = vmatprep.subr.mxu0 %v17_v0  ;;  %v15_v3 = vld [vmem:[%s4718_s1 + $0x8] sm:$0xff]  ;;  %3615 = vmatprep.mubr.msk.f32.mxu0 %vm35_vm0, %v3957_v2 }
   0x3   :  { %3608 = vmatpush3.msra.mxu0 %v17_v0 }
   0x4   :  { %7 = vsyncpa [#allocation3], 0  ;;  %3609 = vmatprep.subr.mxu0 %v16_v1  ;;  %v14_v4 = vld [vmem:[%s4718_s1] sm:$0xff]  ;;  %v3970_v5 = vld [vmem:[%s4717_s0 + $0x8] sm:$0xff]  ;;  %v31_v12 = vlaneseq  ;;  %vm478_vm2 = vcmask 130048   ;;  %v3929_v52 = vmov 0.0  }
   0x5   :  { %3610 = vmatpush3.msra.mxu0 %v16_v1  ;;  %v21_v6 = vld [vmem:[%s4718_s1 + $0x38] sm:$0xff]  ;;  %v20_v7 = vld [vmem:[%s4718_s1 + $0x30] sm:$0xff]  ;;  %v19_v8 = vld [vmem:[%s4718_s1 + $0x28] sm:$0xff]  ;;  %vm3930_vm4 = vmmov 0   ;;  %vm3931_vm15 = vmmov 1  }
   0x6   :  { %3611 = vmatprep.subr.mxu0 %v15_v3  ;;  %3618 = vmatprep.subr.mxu1 %v21_v6  ;;  %v18_v9 = vld [vmem:[%s4718_s1 + $0x20] sm:$0xff]  ;;  %v29_v10 = vld [vmem:[%s4718_s1 + $0x78] sm:$0xff]  ;;  %v3992_v13 = vshrl.u32 %v31_v12, 7  ;;  %v28_v23 = vld [vmem:[%s4718_s1 + $0x70] sm:$0xff]  ;;  %v4040_v38 = vand.u32 127, %v31_v12 }
   0x7   :  { %3612 = vmatpush3.msra.mxu0 %v15_v3  ;;  %3619 = vmatpush3.msra.mxu1 %v21_v6  ;;  %v25_v11 = vld [vmem:[%s4718_s1 + $0x58] sm:$0xff]  ;;  %v3998_v15 = vld [vmem:[%s4718_s1 + $0x80] sm:$0xff]  ;;  %v27_v24 = vld [vmem:[%s4718_s1 + $0x68] sm:$0xff] }
   0x8   :  { %3613 = vmatprep.subr.mxu0 %v14_v4  ;;  %3620 = vmatprep.subr.mxu1 %v20_v7  ;;  %v33_v14 = vsub.s32 0, %v3992_v13  ;;  %v24_v25 = vld [vmem:[%s4718_s1 + $0x50] sm:$0xff]  ;;  %v26_v26 = vld [vmem:[%s4718_s1 + $0x60] sm:$0xff]  ;;  %v23_v27 = vld [vmem:[%s4718_s1 + $0x48] sm:$0xff]  ;;  %v121_v29 = vsub.s32 1, %v3992_v13  ;;  %v206_v35 = vsub.s32 2, %v3992_v13  ;;  %vm474_vm3 = vcmp.eq.s32.totalorder %v3992_v13, %v4040_v38 }
   0x9   :  { %3614 = vmatpush3.msra.mxu0 %v14_v4  ;;  %3621 = vmatpush3.msra.mxu1 %v20_v7  ;;  %v22_v28 = vld [vmem:[%s4718_s1 + $0x40] sm:$0xff]  ;;  %v4043_v41 = vadd.s32 8, %v3992_v13  ;;  %vm659_vm8 = vcmp.eq.s32.totalorder %v4040_v38, 0  ;;  %vm658_vm14 = vcmp.eq.s32.totalorder %v3992_v13, 0 }
   0xa   :  { %3616 = vmatmul.mubr.msk.f32.vlgmr.msra.gmra.mxu0 %vm35_vm0, %v3970_v5  ;;  %3622 = vmatprep.subr.mxu1 %v19_v8  ;;  %v34_v16 = vrot.slane %v3998_v15, %v33_v14  ;;  %v122_v30 = vrot.slane %v3998_v15, %v121_v29  ;;  %v207_v36 = vrot.slane %v3998_v15, %v206_v35 }
   0xb   :  { %3623 = vmatpush3.msra.mxu1 %v19_v8  ;;  %3629 = vmatprep.subr.mxu0 %v25_v11  ;;  %vm475_vm1 = vcmp.eq.s32.totalorder %v4043_v41, %v4040_v38 }
   0xc   :  { %3624 = vmatprep.subr.mxu1 %v18_v9  ;;  %3630 = vmatpush3.msra.mxu0 %v25_v11 }
   0xd   :  { %3625 = vmatpush3.msra.mxu1 %v18_v9  ;;  %3631 = vmatprep.subr.mxu0 %v24_v25 }
   0xe   :  { %3640 = vmatprep.subr.mxu1 %v29_v10  ;;  %3632 = vmatpush3.msra.mxu0 %v24_v25 }
   0xf   :  { %3633 = vmatprep.subr.mxu0 %v23_v27 }
  0x10   :  { %3634 = vmatpush3.msra.mxu0 %v23_v27 }
  0x11   :  { %3635 = vmatprep.subr.mxu0 %v22_v28 }
  0x12   :  { %3636 = vmatpush3.msra.mxu0 %v22_v28 }
  0x13   :  { %3651 = vmatprep.subr.msk.mxu0 %vm35_vm0, %v3970_v5 }
  0xca   :  { %v3617_v17 = vpop.f32.mrf.mxu0 }
  0xcb   :  { %v114_v18 = vadd.f32 %v3617_v17, %v34_v16 }
  0xcc   :  { %v108_v19 = vpop.f32.mrf.mxu0 }
  0xcd   :  { %v109_v20 = vadd.f32 %v108_v19, %v34_v16  ;;  %v118_v22 = vmax.f32 %v114_v18, 0.0  ;;  %v660_v16 = vsel %vm659_vm8, 1.0, %v3929_v52  ;;  %v293_v18 = vsub.s32 3, %v3992_v13 }
  0xcf   :  { %v117_v21 = vmax.f32 %v109_v20, 0.0  ;;  %v4091_v19 = vrot.slane %v3998_v15, %v293_v18 }
  0xd1   :  { %3626 = vmatprep.mubr.msk.f32.mxu1 %vm35_vm0, %v117_v21 }
  0xd2   :  { %3627 = vmatmul.mubr.msk.f32.vlgmr.msra.gmra.mxu1 %vm35_vm0, %v118_v22 }
  0xd3   :  { %3641 = vmatpush3.msra.mxu1 %v29_v10 }
  0xd4   :  { %3642 = vmatprep.subr.mxu1 %v28_v23 }
  0xd5   :  { %3643 = vmatpush3.msra.mxu1 %v28_v23 }
  0xd6   :  { %3644 = vmatprep.subr.mxu1 %v27_v24 }
  0xd7   :  { %3645 = vmatpush3.msra.mxu1 %v27_v24 }
  0xd8   :  { %3646 = vmatprep.subr.mxu1 %v26_v26 }
  0xd9   :  { %3647 = vmatpush3.msra.mxu1 %v26_v26 }
 0x192   :  { %v3628_v31 = vpop.f32.mrf.mxu1 }
 0x193   :  { %v201_v32 = vadd.f32 %v3628_v31, %v122_v30 }
 0x194   :  { %v195_v33 = vpop.f32.mrf.mxu1 }
 0x195   :  { %v196_v34 = vadd.f32 %v195_v33, %v122_v30  ;;  %3658 = vmatprep.subr.msk.mxu1 %vm35_vm0, %v201_v32 }
 0x197   :  { %3637 = vmatprep.mubr.msk.f32.mxu0 %vm35_vm0, %v196_v34 }
 0x198   :  { %3638 = vmatmul.mubr.msk.f32.vlgmr.msra.gmra.mxu0 %vm35_vm0, %v201_v32 }
 0x199   :  { %3652 = vmatpush3.xpose.msk.msra.mxu0 %vm35_vm0, %v3970_v5  ;;  %3655 = vmatprep.mubr.msk.f32.mxu0 %vm35_vm0, %v3957_v2 }
 0x19a   :  { %3653 = vmatprep.subr.msk.mxu0 %vm35_vm0, %v3957_v2 }
 0x19d   :  { %3654 = vmatpush3.xpose.msk.msra.mxu0 %vm35_vm0, %v3957_v2 }
 0x19e   :  { %3665 = vmatprep.subr.mxu0 %v3929_v52 }
 0x1a0   :  { %3656 = vmatmul.mubr.msk.f32.vlgmr.msra.gmra.mxu0 %vm35_vm0, %v3970_v5 }
 0x1a1   :  { %3669 = vmatprep.mubr.msk.f32.mxu0 %vm3930_vm4, %v3929_v52 }
 0x258   :  { %v3639_v37 = vpop.f32.mrf.mxu0 }
 0x259   :  { %v286_v39 = vadd.f32 %v3639_v37, %v207_v36 }
 0x25a   :  { %v280_v40 = vpop.f32.mrf.mxu0 }
 0x25b   :  { %v281_v42 = vadd.f32 %v280_v40, %v207_v36  ;;  %v290_v44 = vmax.f32 %v286_v39, 0.0 }
 0x25d   :  { %v289_v43 = vmax.f32 %v281_v42, 0.0 }
 0x25f   :  { %3648 = vmatprep.mubr.msk.f32.mxu1 %vm35_vm0, %v289_v43 }
 0x260   :  { %3649 = vmatmul.mubr.msk.f32.vlgmr.msra.gmra.mxu1 %vm35_vm0, %v290_v44  ;;  %v3657_v45 = vpop.f32.mrf.mxu0 }
 0x261   :  { %3659 = vmatpush3.xpose.msk.msra.mxu1 %vm35_vm0, %v201_v32  ;;  %3662 = vmatprep.mubr.msk.f32.mxu1 %vm35_vm0, %v196_v34  ;;  %v477_v46 = vsel %vm475_vm1, %v3657_v45, 0.0  ;;  %v495_v59 = vmul.f32 2.0, %v3657_v45 }
 0x262   :  { %3660 = vmatprep.subr.msk.mxu1 %vm35_vm0, %v196_v34  ;;  %v460_v47 = vpop.f32.mrf.mxu0  ;;  %v482_v48 = vsel %vm478_vm2, %v477_v46, 0.0 }
 0x263   :  { %483 = vadd.xlane.f32.xlu0 %v482_v48  ;;  %v476_v49 = vsel %vm474_vm3, %v460_v47, 0.0  ;;  %v494_v61 = vmul.f32 2.0, %v460_v47 }
 0x264   :  { %v479_v50 = vsel %vm478_vm2, %v476_v49, 0.0 }
 0x265   :  { %3661 = vmatpush3.xpose.msk.msra.mxu1 %vm35_vm0, %v196_v34  ;;  %480 = vadd.xlane.f32.xlu1 %v479_v50  ;;  %v485_v51 = vadd.f32 %v482_v48, %v479_v50 }
 0x266   :  { %3672 = vmatprep.subr.mxu1 %v3929_v52 }
 0x267   :  { %v486_v53 = vrot.slane %v485_v51, 4 }
 0x268   :  { %3663 = vmatmul.mubr.msk.f32.vlgmr.msra.gmra.mxu1 %vm35_vm0, %v201_v32 }
 0x269   :  { %3676 = vmatprep.mubr.msk.f32.mxu1 %vm3930_vm4, %v3929_v52  ;;  %v487_v54 = vadd.f32 %v486_v53, %v485_v51 }
 0x26b   :  { %v488_v55 = vrot.slane %v487_v54, 2 }
 0x26d   :  { %v489_v56 = vadd.f32 %v488_v55, %v487_v54 }
 0x26f   :  { %v490_v57 = vrot.slane %v489_v56, 1 }
 0x271   :  { %v491_v58 = vadd.f32 %v490_v57, %v489_v56 }
 0x2ec   :  { %v484_v60 = vpop.xlane.xlu0 %483 }
 0x2ed   :  { %v493_v62 = vadd.f32 %v491_v58, %v484_v60 }
 0x2ee   :  { %v481_v63 = vpop.xlane.xlu1 %480 }
 0x2ef   :  { %v497_v0 = vsub.f32 %v493_v62, %v495_v59  ;;  %v492_v1 = vadd.f32 %v491_v58, %v481_v63 }
 0x2f1   :  { %v499_v2 = vmax.f32 %v497_v0, 0.0  ;;  %v496_v3 = vsub.f32 %v492_v1, %v494_v61 }
 0x2f3   :  { %3893 = vrsqrt.f32 %v499_v2  ;;  %v498_v4 = vmax.f32 %v496_v3, 0.0  ;;  %vm509_vm5 = vcmp.eq.f32.partialorder %v499_v2, inf  ;;  %v512_v6 = vand.u32 2147483648, %v499_v2 }
 0x2f4   :  { %vm511_vm6 = vcmp.eq.f32.partialorder %v499_v2, 0.0 }
 0x2f5   :  { %3895 = vrsqrt.f32 %v498_v4  ;;  %vm502_vm7 = vcmp.eq.f32.partialorder %v498_v4, inf  ;;  %v505_v10 = vand.u32 2147483648, %v498_v4  ;;  %vm504_vm9 = vcmp.eq.f32.partialorder %v498_v4, 0.0 }
 0x300   :  { %v3894_v5 = vpop.eup %3893 }
 0x301   :  { %v508_v7 = vmul.f32 %v3894_v5, %v499_v2 }
 0x302   :  { %v3896_v8 = vpop.eup %3895 }
 0x303   :  { %v510_v9 = vsel %vm509_vm5, %v499_v2, %v508_v7  ;;  %v501_v12 = vmul.f32 %v3896_v8, %v498_v4 }
 0x304   :  { %v4071_v11 = vsel %vm511_vm6, %v512_v6, %v510_v9  ;;  %vm815_vm6 = vcmask 123904  }
 0x305   :  { %3666 = vmatpush3.msra.mxu0 %v4071_v11  ;;  %v503_v14 = vsel %vm502_vm7, %v498_v4, %v501_v12 }
 0x306   :  { %3667 = vmatprep.subr.mxu0 %v3929_v52  ;;  %v4078_v17 = vsel %vm504_vm9, %v505_v10, %v503_v14 }
 0x307   :  { %3668 = vmatpush3.msra.mxu0 %v4078_v17 }
 0x308   :  { %3679 = vmatprep.subr.mxu0 %v3929_v52  ;;  %3670 = vmatmul.mubr.msk.f32.vlgmr.msra.gmra.mxu0 %vm478_vm2, %v660_v16 }
 0x309   :  { %3680 = vmatpush3.msra.mxu0 %v4071_v11  ;;  %3683 = vmatprep.mubr.msk.f32.mxu0 %vm3930_vm4, %v3929_v52 }
 0x30a   :  { %3681 = vmatprep.subr.mxu0 %v3929_v52 }
 0x30b   :  { %3682 = vmatpush3.msra.mxu0 %v4078_v17 }
 0x30c   :  { %3693 = vmatprep.subr.mxu0 %v3929_v52 }
 0x320   :  { %v3650_v20 = vpop.f32.mrf.mxu1 }
 0x321   :  { %v4094_v21 = vadd.f32 %v3650_v20, %v4091_v19 }
 0x322   :  { %v4096_v22 = vpop.f32.mrf.mxu1 }
 0x328   :  { %v3664_v23 = vpop.f32.mrf.mxu1 }
 0x329   :  { %v590_v24 = vsel %vm475_vm1, %v3664_v23, 0.0  ;;  %v607_v36 = vmul.f32 2.0, %v3664_v23  ;;  %vm807_vm1 = vmxor %vm659_vm8, %vm3931_vm15 }
 0x32a   :  { %v580_v25 = vpop.f32.mrf.mxu1  ;;  %v594_v26 = vsel %vm478_vm2, %v590_v24, 0.0 }
 0x32b   :  { %595 = vadd.xlane.f32.xlu0 %v594_v26  ;;  %v589_v15 = vsel %vm474_vm3, %v580_v25, 0.0  ;;  %v606_v40 = vmul.f32 2.0, %v580_v25 }
 0x32c   :  { %v591_v27 = vsel %vm478_vm2, %v589_v15, 0.0 }
 0x32d   :  { %592 = vadd.xlane.f32.xlu1 %v591_v27  ;;  %v597_v28 = vadd.f32 %v594_v26, %v591_v27 }
 0x32f   :  { %v598_v29 = vrot.slane %v597_v28, 4 }
 0x331   :  { %v599_v30 = vadd.f32 %v598_v29, %v597_v28 }
 0x333   :  { %v600_v31 = vrot.slane %v599_v30, 2 }
 0x335   :  { %v601_v32 = vadd.f32 %v600_v31, %v599_v30 }
 0x337   :  { %v602_v33 = vrot.slane %v601_v32, 1 }
 0x339   :  { %v603_v34 = vadd.f32 %v602_v33, %v601_v32 }
 0x3b4   :  { %v596_v35 = vpop.xlane.xlu0 %595 }
 0x3b5   :  { %v605_v37 = vadd.f32 %v603_v34, %v596_v35 }
 0x3b6   :  { %v593_v39 = vpop.xlane.xlu1 %592 }
 0x3b7   :  { %v609_v41 = vsub.f32 %v605_v37, %v607_v36  ;;  %v604_v42 = vadd.f32 %v603_v34, %v593_v39 }
 0x3b9   :  { %v611_v43 = vmax.f32 %v609_v41, 0.0  ;;  %v608_v44 = vsub.f32 %v604_v42, %v606_v40 }
 0x3bb   :  { %3897 = vrsqrt.f32 %v611_v43  ;;  %v610_v45 = vmax.f32 %v608_v44, 0.0  ;;  %vm621_vm10 = vcmp.eq.f32.partialorder %v611_v43, inf  ;;  %v624_v49 = vand.u32 2147483648, %v611_v43 }
 0x3bc   :  { %vm623_vm11 = vcmp.eq.f32.partialorder %v611_v43, 0.0 }
 0x3bd   :  { %3899 = vrsqrt.f32 %v610_v45  ;;  %vm614_vm12 = vcmp.eq.f32.partialorder %v610_v45, inf  ;;  %v617_v56 = vand.u32 2147483648, %v610_v45  ;;  %vm616_vm13 = vcmp.eq.f32.partialorder %v610_v45, 0.0 }
 0x3c8   :  { %v3898_v46 = vpop.eup %3897  ;;  %v730_v48 = vpop.f32.mrf.mxu0 }
 0x3c9   :  { %v620_v47 = vmul.f32 %v3898_v46, %v611_v43 }
 0x3ca   :  { %v3900_v50 = vpop.eup %3899  ;;  %v3671_v53 = vpop.f32.mrf.mxu0 }
 0x3cb   :  { %v622_v51 = vsel %vm621_vm10, %v611_v43, %v620_v47  ;;  %v613_v55 = vmul.f32 %v3900_v50, %v610_v45 }
 0x3cc   :  { %v4106_v54 = vsel %vm623_vm11, %v624_v49, %v622_v51 }
 0x3cd   :  { %3673 = vmatpush3.msra.mxu1 %v4106_v54  ;;  %v615_v57 = vsel %vm614_vm12, %v610_v45, %v613_v55 }
 0x3ce   :  { %3674 = vmatprep.subr.mxu1 %v3929_v52  ;;  %v4110_v58 = vsel %vm616_vm13, %v617_v56, %v615_v57 }
 0x3cf   :  { %3675 = vmatpush3.msra.mxu1 %v4110_v58 }
 0x3d0   :  { %3677 = vmatmul.mubr.msk.f32.vlgmr.msra.gmra.mxu1 %vm478_vm2, %v660_v16  ;;  %3686 = vmatprep.subr.mxu1 %v3929_v52 }
 0x3d1   :  { %3687 = vmatpush3.msra.mxu1 %v4106_v54  ;;  %3690 = vmatprep.mubr.msk.f32.mxu1 %vm3930_vm4, %v3929_v52 }
 0x3d2   :  { %3688 = vmatprep.subr.mxu1 %v3929_v52 }
 0x3d3   :  { %3689 = vmatpush3.msra.mxu1 %v4110_v58 }
 0x3d4   :  { %3700 = vmatprep.subr.mxu1 %v3929_v52 }
 0x490   :  { %v800_v59 = vpop.f32.mrf.mxu1 }
 0x491   :  { %v804_v60 = vsel %vm658_vm14, %v730_v48, %v800_v59  ;;  %v805_v62 = vsel %vm658_vm14, %v800_v59, %v730_v48 }
 0x492   :  { %vm806_vm3 = vcmp.lt.f32.partialorder %v804_v60, 1e+30  ;;  %v3678_v61 = vpop.f32.mrf.mxu1 }
 0x493   :  { %vm4129_vm5 = vmand %vm806_vm3, %vm807_vm1 }
 0x494   :  { %v809_v0 = vsel %vm4129_vm5, %v804_v60, 1e+30  ;;  %v810_v1 = vsel %vm4129_vm5, %v805_v62, 0.0 }
 0x495   :  { %v811_v2 = vsel %vm659_vm8, 1e+30, %v809_v0 }
 0x496   :  { %v813_v3 = vand.u32 4294967280, %v811_v2 }
 0x498   :  { %v814_v4 = vor.u32 %v813_v3, %v4040_v38 }
 0x49a   :  { %v816_v5 = vsel %vm815_vm6, %v814_v4, 2147483647 }
 0x49b   :  { %v818_v6 = vshra.s32 %v816_v5, 16  ;;  %v817_v8 = vand.u32 65535, %v816_v5 }
 0x49d   :  { %v820_v7 = vcvt.s32.f32 %v818_v6  ;;  %v819_v10 = vcvt.s32.f32 %v817_v8 }
 0x49f   :  { %821 = vmin.xlane.f32.xlu0 %v820_v7 }
 0x528   :  { %v822_v9 = vpop.xlane.xlu0 %821 }
 0x529   :  { %vm823_vm7 = vcmp.eq.f32.partialorder %v820_v7, %v822_v9  ;;  %v828_v14 = vcvt.f32.s32 %v822_v9 }
 0x52a   :  { %v824_v12 = vsel %vm823_vm7, %v819_v10, inf }
 0x52b   :  { %825 = vmin.xlane.f32.xlu1 %v824_v12  ;;  %v829_v18 = vshll.u32 %v828_v14, 16 }
 0x5b4   :  { %v826_v16 = vpop.xlane.xlu1 %825 }
 0x5b5   :  { %v827_v20 = vcvt.f32.s32 %v826_v16 }
 0x5b7   :  { %v830_v23 = vadd.s32 %v829_v18, %v827_v20 }
 0x5b9   :  { %vm831_vm9 = vcmp.eq.s32.totalorder %v814_v4, %v830_v23 }
 0x5ba   :  { %v833_v24 = vsel %vm831_vm9, 1.0, %v3929_v52  ;;  %vm4158_vm10 = vmor %vm659_vm8, %vm831_vm9 }
 0x5bb   :  { %3684 = vmatmul.mubr.msk.f32.vlgmr.msra.gmra.mxu0 %vm478_vm2, %v833_v24  ;;  %3691 = vmatmul.mubr.msk.f32.vlgmr.msra.gmra.mxu1 %vm478_vm2, %v833_v24  ;;  %vm980_vm12 = vmxor %vm4158_vm10, %vm3931_vm15 }
 0x5bc   :  { %3694 = vmatpush3.msra.mxu0 %v4071_v11  ;;  %3701 = vmatpush3.msra.mxu1 %v4106_v54 }
 0x5bd   :  { %3695 = vmatprep.subr.mxu0 %v3929_v52  ;;  %3702 = vmatprep.subr.mxu1 %v3929_v52 }
 0x5be   :  { %3696 = vmatpush3.msra.mxu0 %v4078_v17  ;;  %3703 = vmatpush3.msra.mxu1 %v4110_v58 }
 0x5bf   :  { %3697 = vmatprep.mubr.msk.f32.mxu0 %vm3930_vm4, %v3929_v52  ;;  %3704 = vmatprep.mubr.msk.f32.mxu1 %vm3930_vm4, %v3929_v52 }
 0x5c0   :  { %3707 = vmatprep.subr.mxu0 %v3929_v52  ;;  %3714 = vmatprep.subr.mxu1 %v3929_v52 }
 0x67b   :  { %v903_v26 = vpop.f32.mrf.mxu0  ;;  %v973_v15 = vpop.f32.mrf.mxu1 }
 0x67c   :  { %v977_v27 = vsel %vm658_vm14, %v903_v26, %v973_v15  ;;  %v978_v28 = vsel %vm658_vm14, %v973_v15, %v903_v26 }
 0x67d   :  { %vm979_vm11 = vcmp.lt.f32.partialorder %v977_v27, %v809_v0  ;;  %v3685_v29 = vpop.f32.mrf.mxu0  ;;  %v3692_v30 = vpop.f32.mrf.mxu1 }
 0x67e   :  { %vm981_vm13 = vmand %vm979_vm11, %vm980_vm12 }
 0x67f   :  { %v982_v31 = vsel %vm981_vm13, %v977_v27, %v809_v0  ;;  %v4169_v32 = vsel %vm981_vm13, %v978_v28, %v810_v1 }
 0x680   :  { %v984_v33 = vsel %vm4158_vm10, 1e+30, %v982_v31 }
 0x681   :  { %v986_v34 = vand.u32 4294967280, %v984_v33 }
 0x683   :  { %v987_v35 = vor.u32 %v986_v34, %v4040_v38 }
 0x685   :  { %v988_v36 = vsel %vm815_vm6, %v987_v35, 2147483647 }
 0x686   :  { %v990_v37 = vshra.s32 %v988_v36, 16  ;;  %v989_v40 = vand.u32 65535, %v988_v36 }
 0x688   :  { %v992_v39 = vcvt.s32.f32 %v990_v37  ;;  %v991_v42 = vcvt.s32.f32 %v989_v40 }
 0x68a   :  { %993 = vmin.xlane.f32.xlu0 %v992_v39 }
 0x713   :  { %v994_v41 = vpop.xlane.xlu0 %993 }
 0x714   :  { %vm995_vm8 = vcmp.eq.f32.partialorder %v992_v39, %v994_v41  ;;  %v1000_v44 = vcvt.f32.s32 %v994_v41 }
 0x715   :  { %v996_v43 = vsel %vm995_vm8, %v991_v42, inf }
 0x716   :  { %997 = vmin.xlane.f32.xlu1 %v996_v43  ;;  %v1001_v46 = vshll.u32 %v1000_v44, 16 }
 0x79f   :  { %v998_v45 = vpop.xlane.xlu1 %997 }
 0x7a0   :  { %v999_v47 = vcvt.f32.s32 %v998_v45 }
 0x7a2   :  { %v1002_v48 = vadd.s32 %v1001_v46, %v999_v47 }
 0x7a4   :  { %vm1003_vm1 = vcmp.eq.s32.totalorder %v987_v35, %v1002_v48 }
 0x7a5   :  { %v1005_v49 = vsel %vm1003_vm1, 1.0, %v3929_v52  ;;  %vm4192_vm3 = vmor %vm4158_vm10, %vm1003_vm1 }
 0x7a6   :  { %3698 = vmatmul.mubr.msk.f32.vlgmr.msra.gmra.mxu0 %vm478_vm2, %v1005_v49  ;;  %3705 = vmatmul.mubr.msk.f32.vlgmr.msra.gmra.mxu1 %vm478_vm2, %v1005_v49  ;;  %vm1152_vm7 = vmxor %vm4192_vm3, %vm3931_vm15 }
 0x7a7   :  { %3708 = vmatpush3.msra.mxu0 %v4071_v11  ;;  %3715 = vmatpush3.msra.mxu1 %v4106_v54 }
 0x7a8   :  { %3709 = vmatprep.subr.mxu0 %v3929_v52  ;;  %3716 = vmatprep.subr.mxu1 %v3929_v52 }
 0x7a9   :  { %3710 = vmatpush3.msra.mxu0 %v4078_v17  ;;  %3717 = vmatpush3.msra.mxu1 %v4110_v58 }
 0x7aa   :  { %3711 = vmatprep.mubr.msk.f32.mxu0 %vm3930_vm4, %v3929_v52  ;;  %3718 = vmatprep.mubr.msk.f32.mxu1 %vm3930_vm4, %v3929_v52 }
 0x7ab   :  { %3721 = vmatprep.subr.mxu0 %v3929_v52  ;;  %3728 = vmatprep.subr.mxu1 %v3929_v52 }
 0x866   :  { %v1075_v51 = vpop.f32.mrf.mxu0  ;;  %v1145_v53 = vpop.f32.mrf.mxu1 }
 0x867   :  { %v1149_v55 = vsel %vm658_vm14, %v1075_v51, %v1145_v53  ;;  %v1150_v56 = vsel %vm658_vm14, %v1145_v53, %v1075_v51 }
 0x868   :  { %vm1151_vm5 = vcmp.lt.f32.partialorder %v1149_v55, %v982_v31  ;;  %v3699_v57 = vpop.f32.mrf.mxu0  ;;  %v3706_v59 = vpop.f32.mrf.mxu1 }
 0x869   :  { %vm4203_vm9 = vmand %vm1151_vm5, %vm1152_vm7 }
 0x86a   :  { %v1154_v61 = vsel %vm4203_vm9, %v1149_v55, %v982_v31  ;;  %v1155_v62 = vsel %vm4203_vm9, %v1150_v56, %v4169_v32 }
 0x86b   :  { %v1156_v63 = vsel %vm4192_vm3, 1e+30, %v1154_v61 }
 0x86c   :  { %v1158_v0 = vand.u32 4294967280, %v1156_v63 }
 0x86e   :  { %v1159_v1 = vor.u32 %v1158_v0, %v4040_v38 }
 0x870   :  { %v1160_v2 = vsel %vm815_vm6, %v1159_v1, 2147483647 }
 0x871   :  { %v1162_v3 = vshra.s32 %v1160_v2, 16  ;;  %v1161_v5 = vand.u32 65535, %v1160_v2 }
 0x873   :  { %v1164_v4 = vcvt.s32.f32 %v1162_v3  ;;  %v1163_v7 = vcvt.s32.f32 %v1161_v5 }
 0x875   :  { %1165 = vmin.xlane.f32.xlu0 %v1164_v4 }
 0x8fe   :  { %v1166_v6 = vpop.xlane.xlu0 %1165 }
 0x8ff   :  { %vm1167_vm10 = vcmp.eq.f32.partialorder %v1164_v4, %v1166_v6  ;;  %v1172_v9 = vcvt.f32.s32 %v1166_v6 }
 0x900   :  { %v1168_v8 = vsel %vm1167_vm10, %v1163_v7, inf }
 0x901   :  { %1169 = vmin.xlane.f32.xlu1 %v1168_v8  ;;  %v1173_v12 = vshll.u32 %v1172_v9, 16 }
 0x98a   :  { %v1170_v10 = vpop.xlane.xlu1 %1169 }
 0x98b   :  { %v1171_v14 = vcvt.f32.s32 %v1170_v10 }
 0x98d   :  { %v1174_v16 = vadd.s32 %v1173_v12, %v1171_v14 }
 0x98f   :  { %vm1175_vm11 = vcmp.eq.s32.totalorder %v1159_v1, %v1174_v16 }
 0x990   :  { %v1177_v18 = vsel %vm1175_vm11, 1.0, %v3929_v52  ;;  %vm4233_vm12 = vmor %vm4192_vm3, %vm1175_vm11 }
 0x991   :  { %3712 = vmatmul.mubr.msk.f32.vlgmr.msra.gmra.mxu0 %vm478_vm2, %v1177_v18  ;;  %3719 = vmatmul.mubr.msk.f32.vlgmr.msra.gmra.mxu1 %vm478_vm2, %v1177_v18  ;;  %vm1324_vm8 = vmxor %vm4233_vm12, %vm3931_vm15 }
 0x992   :  { %3722 = vmatpush3.msra.mxu0 %v4071_v11  ;;  %3729 = vmatpush3.msra.mxu1 %v4106_v54 }
 0x993   :  { %3723 = vmatprep.subr.mxu0 %v3929_v52  ;;  %3730 = vmatprep.subr.mxu1 %v3929_v52 }
 0x994   :  { %3724 = vmatpush3.msra.mxu0 %v4078_v17  ;;  %3731 = vmatpush3.msra.mxu1 %v4110_v58 }
 0x995   :  { %3725 = vmatprep.mubr.msk.f32.mxu0 %vm3930_vm4, %v3929_v52  ;;  %3732 = vmatprep.mubr.msk.f32.mxu1 %vm3930_vm4, %v3929_v52 }
 0x996   :  { %3735 = vmatprep.subr.mxu0 %v3929_v52  ;;  %3742 = vmatprep.subr.mxu1 %v3929_v52 }
 0xa51   :  { %v1247_v23 = vpop.f32.mrf.mxu0  ;;  %v1317_v24 = vpop.f32.mrf.mxu1 }
 0xa52   :  { %v1321_v25 = vsel %vm658_vm14, %v1247_v23, %v1317_v24  ;;  %v1322_v26 = vsel %vm658_vm14, %v1317_v24, %v1247_v23 }
 0xa53   :  { %vm1323_vm13 = vcmp.lt.f32.partialorder %v1321_v25, %v1154_v61  ;;  %v3713_v15 = vpop.f32.mrf.mxu0  ;;  %v3720_v27 = vpop.f32.mrf.mxu1 }
 0xa54   :  { %vm1325_vm1 = vmand %vm1323_vm13, %vm1324_vm8 }
 0xa55   :  { %v1326_v28 = vsel %vm1325_vm1, %v1321_v25, %v1154_v61  ;;  %v4244_v29 = vsel %vm1325_vm1, %v1322_v26, %v1155_v62 }
 0xa56   :  { %v1328_v30 = vsel %vm4233_vm12, 1e+30, %v1326_v28 }
 0xa57   :  { %v1330_v31 = vand.u32 4294967280, %v1328_v30 }
 0xa59   :  { %v1331_v32 = vor.u32 %v1330_v31, %v4040_v38 }
 0xa5b   :  { %v1332_v33 = vsel %vm815_vm6, %v1331_v32, 2147483647 }
 0xa5c   :  { %v1334_v34 = vshra.s32 %v1332_v33, 16  ;;  %v1333_v36 = vand.u32 65535, %v1332_v33 }
 0xa5e   :  { %v1336_v35 = vcvt.s32.f32 %v1334_v34  ;;  %v1335_v39 = vcvt.s32.f32 %v1333_v36 }
 0xa60   :  { %1337 = vmin.xlane.f32.xlu0 %v1336_v35 }
 0xae9   :  { %v1338_v37 = vpop.xlane.xlu0 %1337 }
 0xaea   :  { %vm1339_vm3 = vcmp.eq.f32.partialorder %v1336_v35, %v1338_v37  ;;  %v1344_v41 = vcvt.f32.s32 %v1338_v37 }
 0xaeb   :  { %v1340_v40 = vsel %vm1339_vm3, %v1335_v39, inf }
 0xaec   :  { %1341 = vmin.xlane.f32.xlu1 %v1340_v40  ;;  %v1345_v43 = vshll.u32 %v1344_v41, 16 }
 0xb75   :  { %v1342_v42 = vpop.xlane.xlu1 %1341 }
 0xb76   :  { %v1343_v44 = vcvt.f32.s32 %v1342_v42 }
 0xb78   :  { %v1346_v45 = vadd.s32 %v1345_v43, %v1343_v44 }
 0xb7a   :  { %vm1347_vm5 = vcmp.eq.s32.totalorder %v1331_v32, %v1346_v45 }
 0xb7b   :  { %v1349_v46 = vsel %vm1347_vm5, 1.0, %v3929_v52  ;;  %vm4267_vm7 = vmor %vm4233_vm12, %vm1347_vm5 }
 0xb7c   :  { %3726 = vmatmul.mubr.msk.f32.vlgmr.msra.gmra.mxu0 %vm478_vm2, %v1349_v46  ;;  %3733 = vmatmul.mubr.msk.f32.vlgmr.msra.gmra.mxu1 %vm478_vm2, %v1349_v46  ;;  %vm1496_vm10 = vmxor %vm4267_vm7, %vm3931_vm15 }
 0xb7d   :  { %3736 = vmatpush3.msra.mxu0 %v4071_v11  ;;  %3743 = vmatpush3.msra.mxu1 %v4106_v54 }
 0xb7e   :  { %3737 = vmatprep.subr.mxu0 %v3929_v52  ;;  %3744 = vmatprep.subr.mxu1 %v3929_v52 }
 0xb7f   :  { %3738 = vmatpush3.msra.mxu0 %v4078_v17  ;;  %3745 = vmatpush3.msra.mxu1 %v4110_v58 }
 0xb80   :  { %3739 = vmatprep.mubr.msk.f32.mxu0 %vm3930_vm4, %v3929_v52  ;;  %3746 = vmatprep.mubr.msk.f32.mxu1 %vm3930_vm4, %v3929_v52 }
 0xb81   :  { %3749 = vmatprep.subr.mxu0 %v3929_v52  ;;  %3756 = vmatprep.subr.mxu1 %v3929_v52 }
 0xc3c   :  { %v1419_v48 = vpop.f32.mrf.mxu0  ;;  %v1489_v49 = vpop.f32.mrf.mxu1 }
 0xc3d   :  { %v1493_v50 = vsel %vm658_vm14, %v1419_v48, %v1489_v49  ;;  %v1494_v51 = vsel %vm658_vm14, %v1489_v49, %v1419_v48 }
 0xc3e   :  { %vm1495_vm9 = vcmp.lt.f32.partialorder %v1493_v50, %v1326_v28  ;;  %v3727_v53 = vpop.f32.mrf.mxu0  ;;  %v3734_v55 = vpop.f32.mrf.mxu1 }
 0xc3f   :  { %vm4278_vm11 = vmand %vm1495_vm9, %vm1496_vm10 }
 0xc40   :  { %v1498_v57 = vsel %vm4278_vm11, %v1493_v50, %v1326_v28  ;;  %v1499_v59 = vsel %vm4278_vm11, %v1494_v51, %v4244_v29 }
 0xc41   :  { %v1500_v60 = vsel %vm4267_vm7, 1e+30, %v1498_v57 }
 0xc42   :  { %v1502_v61 = vand.u32 4294967280, %v1500_v60 }
 0xc44   :  { %v1503_v62 = vor.u32 %v1502_v61, %v4040_v38 }
 0xc46   :  { %v1504_v63 = vsel %vm815_vm6, %v1503_v62, 2147483647 }
 0xc47   :  { %v1506_v0 = vshra.s32 %v1504_v63, 16  ;;  %v1505_v2 = vand.u32 65535, %v1504_v63 }
 0xc49   :  { %v1508_v1 = vcvt.s32.f32 %v1506_v0  ;;  %v1507_v4 = vcvt.s32.f32 %v1505_v2 }
 0xc4b   :  { %1509 = vmin.xlane.f32.xlu0 %v1508_v1 }
 0xcd4   :  { %v1510_v3 = vpop.xlane.xlu0 %1509 }
 0xcd5   :  { %vm1511_vm12 = vcmp.eq.f32.partialorder %v1508_v1, %v1510_v3  ;;  %v1516_v6 = vcvt.f32.s32 %v1510_v3 }
 0xcd6   :  { %v1512_v5 = vsel %vm1511_vm12, %v1507_v4, inf }
 0xcd7   :  { %1513 = vmin.xlane.f32.xlu1 %v1512_v5  ;;  %v1517_v8 = vshll.u32 %v1516_v6, 16 }
 0xd60   :  { %v1514_v7 = vpop.xlane.xlu1 %1513 }
 0xd61   :  { %v1515_v9 = vcvt.f32.s32 %v1514_v7 }
 0xd63   :  { %v1518_v10 = vadd.s32 %v1517_v8, %v1515_v9 }
 0xd65   :  { %vm1519_vm13 = vcmp.eq.s32.totalorder %v1503_v62, %v1518_v10 }
 0xd66   :  { %v1521_v12 = vsel %vm1519_vm13, 1.0, %v3929_v52  ;;  %vm4308_vm8 = vmor %vm4267_vm7, %vm1519_vm13 }
 0xd67   :  { %3740 = vmatmul.mubr.msk.f32.vlgmr.msra.gmra.mxu0 %vm478_vm2, %v1521_v12  ;;  %3747 = vmatmul.mubr.msk.f32.vlgmr.msra.gmra.mxu1 %vm478_vm2, %v1521_v12  ;;  %vm1668_vm3 = vmxor %vm4308_vm8, %vm3931_vm15 }
 0xd68   :  { %3750 = vmatpush3.msra.mxu0 %v4071_v11  ;;  %3757 = vmatpush3.msra.mxu1 %v4106_v54 }
 0xd69   :  { %3751 = vmatprep.subr.mxu0 %v3929_v52  ;;  %3758 = vmatprep.subr.mxu1 %v3929_v52 }
 0xd6a   :  { %3752 = vmatpush3.msra.mxu0 %v4078_v17  ;;  %3759 = vmatpush3.msra.mxu1 %v4110_v58 }
 0xd6b   :  { %3753 = vmatprep.mubr.msk.f32.mxu0 %vm3930_vm4, %v3929_v52  ;;  %3760 = vmatprep.mubr.msk.f32.mxu1 %vm3930_vm4, %v3929_v52 }
 0xd6c   :  { %3763 = vmatprep.subr.mxu0 %v3929_v52  ;;  %3770 = vmatprep.subr.mxu1 %v3929_v52 }
 0xe27   :  { %v1591_v16 = vpop.f32.mrf.mxu0  ;;  %v1661_v18 = vpop.f32.mrf.mxu1 }
 0xe28   :  { %v1665_v20 = vsel %vm658_vm14, %v1591_v16, %v1661_v18  ;;  %v1666_v23 = vsel %vm658_vm14, %v1661_v18, %v1591_v16 }
 0xe29   :  { %vm1667_vm1 = vcmp.lt.f32.partialorder %v1665_v20, %v1498_v57  ;;  %v3741_v24 = vpop.f32.mrf.mxu0  ;;  %v3748_v25 = vpop.f32.mrf.mxu1 }
 0xe2a   :  { %vm1669_vm5 = vmand %vm1667_vm1, %vm1668_vm3 }
 0xe2b   :  { %v1670_v26 = vsel %vm1669_vm5, %v1665_v20, %v1498_v57  ;;  %v4319_v15 = vsel %vm1669_vm5, %v1666_v23, %v1499_v59 }
 0xe2c   :  { %v1672_v27 = vsel %vm4308_vm8, 1e+30, %v1670_v26 }
 0xe2d   :  { %v1674_v28 = vand.u32 4294967280, %v1672_v27 }
 0xe2f   :  { %v1675_v29 = vor.u32 %v1674_v28, %v4040_v38 }
 0xe31   :  { %v1676_v30 = vsel %vm815_vm6, %v1675_v29, 2147483647 }
 0xe32   :  { %v1678_v31 = vshra.s32 %v1676_v30, 16  ;;  %v1677_v33 = vand.u32 65535, %v1676_v30 }
 0xe34   :  { %v1680_v32 = vcvt.s32.f32 %v1678_v31  ;;  %v1679_v35 = vcvt.s32.f32 %v1677_v33 }
 0xe36   :  { %1681 = vmin.xlane.f32.xlu0 %v1680_v32 }
 0xebf   :  { %v1682_v34 = vpop.xlane.xlu0 %1681 }
 0xec0   :  { %vm1683_vm7 = vcmp.eq.f32.partialorder %v1680_v32, %v1682_v34  ;;  %v1688_v37 = vcvt.f32.s32 %v1682_v34 }
 0xec1   :  { %v1684_v36 = vsel %vm1683_vm7, %v1679_v35, inf }
 0xec2   :  { %1685 = vmin.xlane.f32.xlu1 %v1684_v36  ;;  %v1689_v40 = vshll.u32 %v1688_v37, 16 }
 0xf4b   :  { %v1686_v39 = vpop.xlane.xlu1 %1685 }
 0xf4c   :  { %v1687_v41 = vcvt.f32.s32 %v1686_v39 }
 0xf4e   :  { %v1690_v42 = vadd.s32 %v1689_v40, %v1687_v41 }
 0xf50   :  { %vm1691_vm9 = vcmp.eq.s32.totalorder %v1675_v29, %v1690_v42 }
 0xf51   :  { %v1693_v43 = vsel %vm1691_vm9, 1.0, %v3929_v52  ;;  %vm4342_vm10 = vmor %vm4308_vm8, %vm1691_vm9 }
 0xf52   :  { %3754 = vmatmul.mubr.msk.f32.vlgmr.msra.gmra.mxu0 %vm478_vm2, %v1693_v43  ;;  %3761 = vmatmul.mubr.msk.f32.vlgmr.msra.gmra.mxu1 %vm478_vm2, %v1693_v43  ;;  %vm1840_vm12 = vmxor %vm4342_vm10, %vm3931_vm15 }
 0xf53   :  { %3764 = vmatpush3.msra.mxu0 %v4071_v11  ;;  %3771 = vmatpush3.msra.mxu1 %v4106_v54 }
 0xf54   :  { %3765 = vmatprep.subr.mxu0 %v3929_v52  ;;  %3772 = vmatprep.subr.mxu1 %v3929_v52 }
 0xf55   :  { %3766 = vmatpush3.msra.mxu0 %v4078_v17  ;;  %3773 = vmatpush3.msra.mxu1 %v4110_v58 }
 0xf56   :  { %3767 = vmatprep.mubr.msk.f32.mxu0 %vm3930_vm4, %v3929_v52  ;;  %3774 = vmatprep.mubr.msk.f32.mxu1 %vm3930_vm4, %v3929_v52 }
 0xf57   :  { %3777 = vmatprep.subr.mxu0 %v3929_v52  ;;  %3784 = vmatprep.subr.mxu1 %v3929_v52 }
0x1012   :  { %v1763_v45 = vpop.f32.mrf.mxu0  ;;  %v1833_v46 = vpop.f32.mrf.mxu1 }
0x1013   :  { %v1837_v47 = vsel %vm658_vm14, %v1763_v45, %v1833_v46  ;;  %v1838_v48 = vsel %vm658_vm14, %v1833_v46, %v1763_v45 }
0x1014   :  { %vm1839_vm11 = vcmp.lt.f32.partialorder %v1837_v47, %v1670_v26  ;;  %v3755_v49 = vpop.f32.mrf.mxu0  ;;  %v3762_v50 = vpop.f32.mrf.mxu1 }
0x1015   :  { %vm4353_vm13 = vmand %vm1839_vm11, %vm1840_vm12 }
0x1016   :  { %v1842_v53 = vsel %vm4353_vm13, %v1837_v47, %v1670_v26  ;;  %v1843_v55 = vsel %vm4353_vm13, %v1838_v48, %v4319_v15 }
0x1017   :  { %v1844_v56 = vsel %vm4342_vm10, 1e+30, %v1842_v53 }
0x1018   :  { %v1846_v57 = vand.u32 4294967280, %v1844_v56 }
0x101a   :  { %v1847_v59 = vor.u32 %v1846_v57, %v4040_v38 }
0x101c   :  { %v1848_v60 = vsel %vm815_vm6, %v1847_v59, 2147483647 }
0x101d   :  { %v1850_v61 = vshra.s32 %v1848_v60, 16  ;;  %v1849_v63 = vand.u32 65535, %v1848_v60 }
0x101f   :  { %v1852_v62 = vcvt.s32.f32 %v1850_v61  ;;  %v1851_v1 = vcvt.s32.f32 %v1849_v63 }
0x1021   :  { %1853 = vmin.xlane.f32.xlu0 %v1852_v62 }
0x10aa   :  { %v1854_v0 = vpop.xlane.xlu0 %1853 }
0x10ab   :  { %vm1855_vm8 = vcmp.eq.f32.partialorder %v1852_v62, %v1854_v0  ;;  %v1860_v3 = vcvt.f32.s32 %v1854_v0 }
0x10ac   :  { %v1856_v2 = vsel %vm1855_vm8, %v1851_v1, inf }
0x10ad   :  { %1857 = vmin.xlane.f32.xlu1 %v1856_v2  ;;  %v1861_v5 = vshll.u32 %v1860_v3, 16 }
0x1136   :  { %v1858_v4 = vpop.xlane.xlu1 %1857 }
0x1137   :  { %v1859_v6 = vcvt.f32.s32 %v1858_v4 }
0x1139   :  { %v1862_v7 = vadd.s32 %v1861_v5, %v1859_v6 }
0x113b   :  { %vm1863_vm1 = vcmp.eq.s32.totalorder %v1847_v59, %v1862_v7 }
0x113c   :  { %v1865_v8 = vsel %vm1863_vm1, 1.0, %v3929_v52  ;;  %vm4383_vm3 = vmor %vm4342_vm10, %vm1863_vm1 }
0x113d   :  { %3768 = vmatmul.mubr.msk.f32.vlgmr.msra.gmra.mxu0 %vm478_vm2, %v1865_v8  ;;  %3775 = vmatmul.mubr.msk.f32.vlgmr.msra.gmra.mxu1 %vm478_vm2, %v1865_v8  ;;  %vm2012_vm7 = vmxor %vm4383_vm3, %vm3931_vm15 }
0x113e   :  { %3778 = vmatpush3.msra.mxu0 %v4071_v11  ;;  %3785 = vmatpush3.msra.mxu1 %v4106_v54 }
0x113f   :  { %3779 = vmatprep.subr.mxu0 %v3929_v52  ;;  %3786 = vmatprep.subr.mxu1 %v3929_v52 }
0x1140   :  { %3780 = vmatpush3.msra.mxu0 %v4078_v17  ;;  %3787 = vmatpush3.msra.mxu1 %v4110_v58 }
0x1141   :  { %3781 = vmatprep.mubr.msk.f32.mxu0 %vm3930_vm4, %v3929_v52  ;;  %3788 = vmatprep.mubr.msk.f32.mxu1 %vm3930_vm4, %v3929_v52 }
0x1142   :  { %3791 = vmatprep.subr.mxu0 %v3929_v52  ;;  %3798 = vmatprep.subr.mxu1 %v3929_v52 }
0x11fd   :  { %v1935_v10 = vpop.f32.mrf.mxu0  ;;  %v2005_v12 = vpop.f32.mrf.mxu1 }
0x11fe   :  { %v2009_v14 = vsel %vm658_vm14, %v1935_v10, %v2005_v12  ;;  %v2010_v16 = vsel %vm658_vm14, %v2005_v12, %v1935_v10 }
0x11ff   :  { %vm2011_vm5 = vcmp.lt.f32.partialorder %v2009_v14, %v1842_v53  ;;  %v3769_v18 = vpop.f32.mrf.mxu0  ;;  %v3776_v20 = vpop.f32.mrf.mxu1 }
0x1200   :  { %vm2013_vm9 = vmand %vm2011_vm5, %vm2012_vm7 }
0x1201   :  { %v2014_v23 = vsel %vm2013_vm9, %v2009_v14, %v1842_v53  ;;  %v4394_v24 = vsel %vm2013_vm9, %v2010_v16, %v1843_v55 }
0x1202   :  { %v2016_v25 = vsel %vm4383_vm3, 1e+30, %v2014_v23 }
0x1203   :  { %v2018_v26 = vand.u32 4294967280, %v2016_v25 }
0x1205   :  { %v2019_v15 = vor.u32 %v2018_v26, %v4040_v38 }
0x1207   :  { %v2020_v27 = vsel %vm815_vm6, %v2019_v15, 2147483647 }
0x1208   :  { %v2022_v28 = vshra.s32 %v2020_v27, 16  ;;  %v2021_v30 = vand.u32 65535, %v2020_v27 }
0x120a   :  { %v2024_v29 = vcvt.s32.f32 %v2022_v28  ;;  %v2023_v32 = vcvt.s32.f32 %v2021_v30 }
0x120c   :  { %2025 = vmin.xlane.f32.xlu0 %v2024_v29 }
0x1295   :  { %v2026_v31 = vpop.xlane.xlu0 %2025 }
0x1296   :  { %vm2027_vm10 = vcmp.eq.f32.partialorder %v2024_v29, %v2026_v31  ;;  %v2032_v34 = vcvt.f32.s32 %v2026_v31 }
0x1297   :  { %v2028_v33 = vsel %vm2027_vm10, %v2023_v32, inf }
0x1298   :  { %2029 = vmin.xlane.f32.xlu1 %v2028_v33  ;;  %v2033_v36 = vshll.u32 %v2032_v34, 16 }
0x1321   :  { %v2030_v35 = vpop.xlane.xlu1 %2029 }
0x1322   :  { %v2031_v37 = vcvt.f32.s32 %v2030_v35 }
0x1324   :  { %v2034_v39 = vadd.s32 %v2033_v36, %v2031_v37 }
0x1326   :  { %vm2035_vm11 = vcmp.eq.s32.totalorder %v2019_v15, %v2034_v39 }
0x1327   :  { %v2037_v40 = vsel %vm2035_vm11, 1.0, %v3929_v52  ;;  %vm4417_vm12 = vmor %vm4383_vm3, %vm2035_vm11 }
0x1328   :  { %3782 = vmatmul.mubr.msk.f32.vlgmr.msra.gmra.mxu0 %vm478_vm2, %v2037_v40  ;;  %3789 = vmatmul.mubr.msk.f32.vlgmr.msra.gmra.mxu1 %vm478_vm2, %v2037_v40  ;;  %vm2184_vm8 = vmxor %vm4417_vm12, %vm3931_vm15 }
0x1329   :  { %3792 = vmatpush3.msra.mxu0 %v4071_v11  ;;  %3799 = vmatpush3.msra.mxu1 %v4106_v54 }
0x132a   :  { %3793 = vmatprep.subr.mxu0 %v3929_v52  ;;  %3800 = vmatprep.subr.mxu1 %v3929_v52 }
0x132b   :  { %3794 = vmatpush3.msra.mxu0 %v4078_v17  ;;  %3801 = vmatpush3.msra.mxu1 %v4110_v58 }
0x132c   :  { %3795 = vmatprep.mubr.msk.f32.mxu0 %vm3930_vm4, %v3929_v52  ;;  %3802 = vmatprep.mubr.msk.f32.mxu1 %vm3930_vm4, %v3929_v52 }
0x132d   :  { %3805 = vmatprep.subr.mxu0 %v3929_v52  ;;  %3812 = vmatprep.subr.mxu1 %v3929_v52 }
0x13e8   :  { %v2107_v42 = vpop.f32.mrf.mxu0  ;;  %v2177_v43 = vpop.f32.mrf.mxu1 }
0x13e9   :  { %v2181_v44 = vsel %vm658_vm14, %v2107_v42, %v2177_v43  ;;  %v2182_v45 = vsel %vm658_vm14, %v2177_v43, %v2107_v42 }
0x13ea   :  { %vm2183_vm13 = vcmp.lt.f32.partialorder %v2181_v44, %v2014_v23  ;;  %v3783_v46 = vpop.f32.mrf.mxu0  ;;  %v3790_v47 = vpop.f32.mrf.mxu1 }
0x13eb   :  { %vm4428_vm1 = vmand %vm2183_vm13, %vm2184_vm8 }
0x13ec   :  { %v2186_v49 = vsel %vm4428_vm1, %v2181_v44, %v2014_v23  ;;  %v2187_v50 = vsel %vm4428_vm1, %v2182_v45, %v4394_v24 }
0x13ed   :  { %v2188_v51 = vsel %vm4417_vm12, 1e+30, %v2186_v49 }
0x13ee   :  { %v2190_v53 = vand.u32 4294967280, %v2188_v51 }
0x13f0   :  { %v2191_v55 = vor.u32 %v2190_v53, %v4040_v38 }
0x13f2   :  { %v2192_v56 = vsel %vm815_vm6, %v2191_v55, 2147483647 }
0x13f3   :  { %v2194_v57 = vshra.s32 %v2192_v56, 16  ;;  %v2193_v60 = vand.u32 65535, %v2192_v56 }
0x13f5   :  { %v2196_v59 = vcvt.s32.f32 %v2194_v57  ;;  %v2195_v62 = vcvt.s32.f32 %v2193_v60 }
0x13f7   :  { %2197 = vmin.xlane.f32.xlu0 %v2196_v59 }
0x1480   :  { %v2198_v61 = vpop.xlane.xlu0 %2197 }
0x1481   :  { %vm2199_vm3 = vcmp.eq.f32.partialorder %v2196_v59, %v2198_v61  ;;  %v2204_v0 = vcvt.f32.s32 %v2198_v61 }
0x1482   :  { %v2200_v63 = vsel %vm2199_vm3, %v2195_v62, inf }
0x1483   :  { %2201 = vmin.xlane.f32.xlu1 %v2200_v63  ;;  %v2205_v2 = vshll.u32 %v2204_v0, 16 }
0x150c   :  { %v2202_v1 = vpop.xlane.xlu1 %2201 }
0x150d   :  { %v2203_v3 = vcvt.f32.s32 %v2202_v1 }
0x150f   :  { %v2206_v4 = vadd.s32 %v2205_v2, %v2203_v3 }
0x1511   :  { %vm2207_vm5 = vcmp.eq.s32.totalorder %v2191_v55, %v2206_v4 }
0x1512   :  { %v2209_v5 = vsel %vm2207_vm5, 1.0, %v3929_v52  ;;  %vm4458_vm7 = vmor %vm4417_vm12, %vm2207_vm5 }
0x1513   :  { %3796 = vmatmul.mubr.msk.f32.vlgmr.msra.gmra.mxu0 %vm478_vm2, %v2209_v5  ;;  %3803 = vmatmul.mubr.msk.f32.vlgmr.msra.gmra.mxu1 %vm478_vm2, %v2209_v5  ;;  %vm2356_vm10 = vmxor %vm4458_vm7, %vm3931_vm15 }
0x1514   :  { %3806 = vmatpush3.msra.mxu0 %v4071_v11  ;;  %3813 = vmatpush3.msra.mxu1 %v4106_v54 }
0x1515   :  { %3807 = vmatprep.subr.mxu0 %v3929_v52  ;;  %3814 = vmatprep.subr.mxu1 %v3929_v52 }
0x1516   :  { %3808 = vmatpush3.msra.mxu0 %v4078_v17  ;;  %3815 = vmatpush3.msra.mxu1 %v4110_v58 }
0x1517   :  { %3809 = vmatprep.mubr.msk.f32.mxu0 %vm3930_vm4, %v3929_v52  ;;  %3816 = vmatprep.mubr.msk.f32.mxu1 %vm3930_vm4, %v3929_v52 }
0x1518   :  { %3819 = vmatprep.subr.mxu0 %v3929_v52  ;;  %3826 = vmatprep.subr.mxu1 %v3929_v52 }
0x15d3   :  { %v2279_v7 = vpop.f32.mrf.mxu0  ;;  %v2349_v8 = vpop.f32.mrf.mxu1 }
0x15d4   :  { %v2353_v9 = vsel %vm658_vm14, %v2279_v7, %v2349_v8  ;;  %v2354_v10 = vsel %vm658_vm14, %v2349_v8, %v2279_v7 }
0x15d5   :  { %vm2355_vm9 = vcmp.lt.f32.partialorder %v2353_v9, %v2186_v49  ;;  %v3797_v12 = vpop.f32.mrf.mxu0  ;;  %v3804_v14 = vpop.f32.mrf.mxu1 }
0x15d6   :  { %vm2357_vm11 = vmand %vm2355_vm9, %vm2356_vm10 }
0x15d7   :  { %v2358_v16 = vsel %vm2357_vm11, %v2353_v9, %v2186_v49  ;;  %v4469_v18 = vsel %vm2357_vm11, %v2354_v10, %v2187_v50 }
0x15d8   :  { %v2360_v20 = vsel %vm4458_vm7, 1e+30, %v2358_v16 }
0x15d9   :  { %v2362_v23 = vand.u32 4294967280, %v2360_v20 }
0x15db   :  { %v2363_v24 = vor.u32 %v2362_v23, %v4040_v38 }
0x15dd   :  { %v2364_v25 = vsel %vm815_vm6, %v2363_v24, 2147483647 }
0x15de   :  { %v2366_v26 = vshra.s32 %v2364_v25, 16  ;;  %v2365_v27 = vand.u32 65535, %v2364_v25 }
0x15e0   :  { %v2368_v15 = vcvt.s32.f32 %v2366_v26  ;;  %v2367_v29 = vcvt.s32.f32 %v2365_v27 }
0x15e2   :  { %2369 = vmin.xlane.f32.xlu0 %v2368_v15 }
0x166b   :  { %v2370_v28 = vpop.xlane.xlu0 %2369 }
0x166c   :  { %vm2371_vm12 = vcmp.eq.f32.partialorder %v2368_v15, %v2370_v28  ;;  %v2376_v31 = vcvt.f32.s32 %v2370_v28 }
0x166d   :  { %v2372_v30 = vsel %vm2371_vm12, %v2367_v29, inf }
0x166e   :  { %2373 = vmin.xlane.f32.xlu1 %v2372_v30  ;;  %v2377_v33 = vshll.u32 %v2376_v31, 16 }
0x16f7   :  { %v2374_v32 = vpop.xlane.xlu1 %2373 }
0x16f8   :  { %v2375_v34 = vcvt.f32.s32 %v2374_v32 }
0x16fa   :  { %v2378_v35 = vadd.s32 %v2377_v33, %v2375_v34 }
0x16fc   :  { %vm2379_vm13 = vcmp.eq.s32.totalorder %v2363_v24, %v2378_v35 }
0x16fd   :  { %v2381_v36 = vsel %vm2379_vm13, 1.0, %v3929_v52  ;;  %vm4492_vm8 = vmor %vm4458_vm7, %vm2379_vm13 }
0x16fe   :  { %3810 = vmatmul.mubr.msk.f32.vlgmr.msra.gmra.mxu0 %vm478_vm2, %v2381_v36  ;;  %3817 = vmatmul.mubr.msk.f32.vlgmr.msra.gmra.mxu1 %vm478_vm2, %v2381_v36  ;;  %vm2528_vm3 = vmxor %vm4492_vm8, %vm3931_vm15 }
0x16ff   :  { %3820 = vmatpush3.msra.mxu0 %v4071_v11  ;;  %3827 = vmatpush3.msra.mxu1 %v4106_v54 }
0x1700   :  { %3821 = vmatprep.subr.mxu0 %v3929_v52  ;;  %3828 = vmatprep.subr.mxu1 %v3929_v52 }
0x1701   :  { %3822 = vmatpush3.msra.mxu0 %v4078_v17  ;;  %3829 = vmatpush3.msra.mxu1 %v4110_v58 }
0x1702   :  { %3823 = vmatprep.mubr.msk.f32.mxu0 %vm3930_vm4, %v3929_v52  ;;  %3830 = vmatprep.mubr.msk.f32.mxu1 %vm3930_vm4, %v3929_v52 }
0x1703   :  { %3833 = vmatprep.subr.mxu0 %v3929_v52  ;;  %3840 = vmatprep.subr.mxu1 %v3929_v52 }
0x17be   :  { %v2451_v39 = vpop.f32.mrf.mxu0  ;;  %v2521_v40 = vpop.f32.mrf.mxu1 }
0x17bf   :  { %v2525_v41 = vsel %vm658_vm14, %v2451_v39, %v2521_v40  ;;  %v2526_v42 = vsel %vm658_vm14, %v2521_v40, %v2451_v39 }
0x17c0   :  { %vm2527_vm1 = vcmp.lt.f32.partialorder %v2525_v41, %v2358_v16  ;;  %v3811_v43 = vpop.f32.mrf.mxu0  ;;  %v3818_v44 = vpop.f32.mrf.mxu1 }
0x17c1   :  { %vm4503_vm5 = vmand %vm2527_vm1, %vm2528_vm3 }
0x17c2   :  { %v2530_v46 = vsel %vm4503_vm5, %v2525_v41, %v2358_v16  ;;  %v2531_v47 = vsel %vm4503_vm5, %v2526_v42, %v4469_v18 }
0x17c3   :  { %v2532_v48 = vsel %vm4492_vm8, 1e+30, %v2530_v46 }
0x17c4   :  { %v2534_v49 = vand.u32 4294967280, %v2532_v48 }
0x17c6   :  { %v2535_v50 = vor.u32 %v2534_v49, %v4040_v38 }
0x17c8   :  { %v2536_v51 = vsel %vm815_vm6, %v2535_v50, 2147483647 }
0x17c9   :  { %v2538_v53 = vshra.s32 %v2536_v51, 16  ;;  %v2537_v56 = vand.u32 65535, %v2536_v51 }
0x17cb   :  { %v2540_v55 = vcvt.s32.f32 %v2538_v53  ;;  %v2539_v59 = vcvt.s32.f32 %v2537_v56 }
0x17cd   :  { %2541 = vmin.xlane.f32.xlu0 %v2540_v55 }
0x1856   :  { %v2542_v57 = vpop.xlane.xlu0 %2541 }
0x1857   :  { %vm2543_vm7 = vcmp.eq.f32.partialorder %v2540_v55, %v2542_v57  ;;  %v2548_v61 = vcvt.f32.s32 %v2542_v57 }
0x1858   :  { %v2544_v60 = vsel %vm2543_vm7, %v2539_v59, inf }
0x1859   :  { %2545 = vmin.xlane.f32.xlu1 %v2544_v60  ;;  %v2549_v63 = vshll.u32 %v2548_v61, 16 }
0x18e2   :  { %v2546_v62 = vpop.xlane.xlu1 %2545 }
0x18e3   :  { %v2547_v0 = vcvt.f32.s32 %v2546_v62 }
0x18e5   :  { %v2550_v1 = vadd.s32 %v2549_v63, %v2547_v0 }
0x18e7   :  { %vm2551_vm9 = vcmp.eq.s32.totalorder %v2535_v50, %v2550_v1 }
0x18e8   :  { %v2553_v2 = vsel %vm2551_vm9, 1.0, %v3929_v52  ;;  %vm4533_vm10 = vmor %vm4492_vm8, %vm2551_vm9 }
0x18e9   :  { %3824 = vmatmul.mubr.msk.f32.vlgmr.msra.gmra.mxu0 %vm478_vm2, %v2553_v2  ;;  %3831 = vmatmul.mubr.msk.f32.vlgmr.msra.gmra.mxu1 %vm478_vm2, %v2553_v2  ;;  %vm2700_vm12 = vmxor %vm4533_vm10, %vm3931_vm15 }
0x18ea   :  { %3834 = vmatpush3.msra.mxu0 %v4071_v11  ;;  %3841 = vmatpush3.msra.mxu1 %v4106_v54 }
0x18eb   :  { %3835 = vmatprep.subr.mxu0 %v3929_v52  ;;  %3842 = vmatprep.subr.mxu1 %v3929_v52 }
0x18ec   :  { %3836 = vmatpush3.msra.mxu0 %v4078_v17  ;;  %3843 = vmatpush3.msra.mxu1 %v4110_v58 }
0x18ed   :  { %3837 = vmatprep.mubr.msk.f32.mxu0 %vm3930_vm4, %v3929_v52  ;;  %3844 = vmatprep.mubr.msk.f32.mxu1 %vm3930_vm4, %v3929_v52 }
0x18ee   :  { %3847 = vmatprep.subr.mxu0 %v3929_v52  ;;  %3854 = vmatprep.subr.mxu1 %v3929_v52 }
0x19a9   :  { %v2623_v4 = vpop.f32.mrf.mxu0  ;;  %v2693_v5 = vpop.f32.mrf.mxu1 }
0x19aa   :  { %v2697_v6 = vsel %vm658_vm14, %v2623_v4, %v2693_v5  ;;  %v2698_v7 = vsel %vm658_vm14, %v2693_v5, %v2623_v4 }
0x19ab   :  { %vm2699_vm11 = vcmp.lt.f32.partialorder %v2697_v6, %v2530_v46  ;;  %v3825_v8 = vpop.f32.mrf.mxu0  ;;  %v3832_v9 = vpop.f32.mrf.mxu1 }
0x19ac   :  { %vm2701_vm13 = vmand %vm2699_vm11, %vm2700_vm12 }
0x19ad   :  { %v2702_v10 = vsel %vm2701_vm13, %v2697_v6, %v2530_v46  ;;  %v4544_v12 = vsel %vm2701_vm13, %v2698_v7, %v2531_v47 }
0x19ae   :  { %v2704_v14 = vsel %vm4533_vm10, 1e+30, %v2702_v10 }
0x19af   :  { %v2706_v16 = vand.u32 4294967280, %v2704_v14 }
0x19b1   :  { %v2707_v18 = vor.u32 %v2706_v16, %v4040_v38 }
0x19b3   :  { %v2708_v20 = vsel %vm815_vm6, %v2707_v18, 2147483647 }
0x19b4   :  { %v2710_v23 = vshra.s32 %v2708_v20, 16  ;;  %v2709_v25 = vand.u32 65535, %v2708_v20 }
0x19b6   :  { %v2712_v24 = vcvt.s32.f32 %v2710_v23  ;;  %v2711_v15 = vcvt.s32.f32 %v2709_v25 }
0x19b8   :  { %2713 = vmin.xlane.f32.xlu0 %v2712_v24 }
0x1a41   :  { %v2714_v26 = vpop.xlane.xlu0 %2713 }
0x1a42   :  { %vm2715_vm8 = vcmp.eq.f32.partialorder %v2712_v24, %v2714_v26  ;;  %v2720_v28 = vcvt.f32.s32 %v2714_v26 }
0x1a43   :  { %v2716_v27 = vsel %vm2715_vm8, %v2711_v15, inf }
0x1a44   :  { %2717 = vmin.xlane.f32.xlu1 %v2716_v27  ;;  %v2721_v30 = vshll.u32 %v2720_v28, 16 }
0x1acd   :  { %v2718_v29 = vpop.xlane.xlu1 %2717 }
0x1ace   :  { %v2719_v31 = vcvt.f32.s32 %v2718_v29 }
0x1ad0   :  { %v2722_v32 = vadd.s32 %v2721_v30, %v2719_v31 }
0x1ad2   :  { %vm2723_vm1 = vcmp.eq.s32.totalorder %v2707_v18, %v2722_v32 }
0x1ad3   :  { %v2725_v33 = vsel %vm2723_vm1, 1.0, %v3929_v52  ;;  %vm4567_vm3 = vmor %vm4533_vm10, %vm2723_vm1 }
0x1ad4   :  { %3838 = vmatmul.mubr.msk.f32.vlgmr.msra.gmra.mxu0 %vm478_vm2, %v2725_v33  ;;  %3845 = vmatmul.mubr.msk.f32.vlgmr.msra.gmra.mxu1 %vm478_vm2, %v2725_v33  ;;  %vm2872_vm7 = vmxor %vm4567_vm3, %vm3931_vm15 }
0x1ad5   :  { %3848 = vmatpush3.msra.mxu0 %v4071_v11  ;;  %3855 = vmatpush3.msra.mxu1 %v4106_v54 }
0x1ad6   :  { %3849 = vmatprep.subr.mxu0 %v3929_v52  ;;  %3856 = vmatprep.subr.mxu1 %v3929_v52 }
0x1ad7   :  { %3850 = vmatpush3.msra.mxu0 %v4078_v17  ;;  %3857 = vmatpush3.msra.mxu1 %v4110_v58 }
0x1ad8   :  { %3851 = vmatprep.mubr.msk.f32.mxu0 %vm3930_vm4, %v3929_v52  ;;  %3858 = vmatprep.mubr.msk.f32.mxu1 %vm3930_vm4, %v3929_v52 }
0x1ad9   :  { %3861 = vmatprep.subr.mxu0 %v3929_v52  ;;  %3868 = vmatprep.subr.mxu1 %v3929_v52 }
0x1b94   :  { %v2795_v35 = vpop.f32.mrf.mxu0  ;;  %v2865_v36 = vpop.f32.mrf.mxu1 }
0x1b95   :  { %v2869_v37 = vsel %vm658_vm14, %v2795_v35, %v2865_v36  ;;  %v2870_v39 = vsel %vm658_vm14, %v2865_v36, %v2795_v35 }
0x1b96   :  { %vm2871_vm5 = vcmp.lt.f32.partialorder %v2869_v37, %v2702_v10  ;;  %v3839_v40 = vpop.f32.mrf.mxu0  ;;  %v3846_v41 = vpop.f32.mrf.mxu1 }
0x1b97   :  { %vm4578_vm9 = vmand %vm2871_vm5, %vm2872_vm7 }
0x1b98   :  { %v2874_v43 = vsel %vm4578_vm9, %v2869_v37, %v2702_v10  ;;  %v2875_v44 = vsel %vm4578_vm9, %v2870_v39, %v4544_v12 }
0x1b99   :  { %v2876_v45 = vsel %vm4567_vm3, 1e+30, %v2874_v43 }
0x1b9a   :  { %v2878_v46 = vand.u32 4294967280, %v2876_v45 }
0x1b9c   :  { %v2879_v47 = vor.u32 %v2878_v46, %v4040_v38 }
0x1b9e   :  { %v2880_v48 = vsel %vm815_vm6, %v2879_v47, 2147483647 }
0x1b9f   :  { %v2882_v49 = vshra.s32 %v2880_v48, 16  ;;  %v2881_v51 = vand.u32 65535, %v2880_v48  ;;  %v368_v48 = vadd.f32 %v4096_v22, %v4091_v19 }
0x1ba1   :  { %v2884_v50 = vcvt.s32.f32 %v2882_v49  ;;  %v2883_v55 = vcvt.s32.f32 %v2881_v51  ;;  %v3905_v49 = vld [vmem:[%s4717_s0] sm:$0xff]  ;;  %v626_v51 = vsel %vm478_vm2, %v4078_v17, -inf }
0x1ba3   :  { %2885 = vmin.xlane.f32.xlu0 %v2884_v50 }
0x1c2c   :  { %v2886_v53 = vpop.xlane.xlu0 %2885 }
0x1c2d   :  { %vm2887_vm10 = vcmp.eq.f32.partialorder %v2884_v50, %v2886_v53  ;;  %v2892_v57 = vcvt.f32.s32 %v2886_v53  ;;  %v376_v50 = vsub.f32 %v368_v48, %v3905_v49  ;;  %v642_v53 = vsel %vm478_vm2, %v4110_v58, -inf }
0x1c2e   :  { %v2888_v56 = vsel %vm2887_vm10, %v2883_v55, inf }
0x1c2f   :  { %2889 = vmin.xlane.f32.xlu1 %v2888_v56  ;;  %v2893_v60 = vshll.u32 %v2892_v57, 16  ;;  %v378_v55 = vmul.f32 %v376_v50, %v376_v50 }
0x1c31   :  { %v380_v56 = vsel %vm35_vm0, %v378_v55, 0.0 }
0x1cb8   :  { %v2890_v59 = vpop.xlane.xlu1 %2889 }
0x1cb9   :  { %v2891_v61 = vcvt.f32.s32 %v2890_v59 }
0x1cbb   :  { %v2894_v62 = vadd.s32 %v2893_v60, %v2891_v61  ;;  %v3906_v60 = vld [vmem:[%s4717_s0 + $0x8] sm:$0xff]  ;;  %v645_v61 = vsel %vm478_vm2, %v4106_v54, -inf  ;;  %s3932_s0 = smov [#allocation2]  }
0x1cbc   :  { %s3423_s22 = sshll.u32 %s3932_s0, 4  ;;  %s3424_s22 = int_to_ptr.vmem [resolvable:$true] %s3423_s22 }
0x1cbd   :  { %vm2895_vm11 = vcmp.eq.s32.totalorder %v2879_v47, %v2894_v62  ;;  %s3907_s23 = scalar_lea.vmem %s3424_s22, 16  ;;  %s3911_s24 = scalar_lea.vmem %s3424_s22, 32 }
0x1cbe   :  { %v2897_v63 = vsel %vm2895_vm11, 1.0, %v3929_v52  ;;  %vm4608_vm12 = vmor %vm4567_vm3, %vm2895_vm11  ;;  %p3908_p0 = scmp.ne.s32.totalorder %s3424_s22, %s3907_s23  ;;  %p3912_p1 = scmp.lt.s32.totalorder %s3424_s22, %s3424_s22 }
0x1cbf   :  { %3852 = vmatmul.mubr.msk.f32.vlgmr.msra.gmra.mxu0 %vm478_vm2, %v2897_v63  ;;  %3859 = vmatmul.mubr.msk.f32.vlgmr.msra.gmra.mxu1 %vm478_vm2, %v2897_v63  ;;  %vm3044_vm8 = vmxor %vm4608_vm12, %vm3931_vm15  ;;  %p3913_p2 = scmp.lt.s32.totalorder %s3911_s24, %s3907_s23 }
0x1cc0   :  { %3862 = vmatpush3.msra.mxu0 %v4071_v11  ;;  %3869 = vmatpush3.msra.mxu1 %v4106_v54 }
0x1cc1   :  { %3863 = vmatprep.subr.mxu0 %v3929_v52  ;;  %3870 = vmatprep.subr.mxu1 %v3929_v52  ;;  %p3914_p3 = por %p3913_p2, %p3912_p1 }
0x1cc2   :  { %3864 = vmatpush3.msra.mxu0 %v4078_v17  ;;  %3871 = vmatpush3.msra.mxu1 %v4110_v58 }
0x1cc3   :  { %3865 = vmatprep.mubr.msk.f32.mxu0 %vm3930_vm4, %v3929_v52  ;;  %3872 = vmatprep.mubr.msk.f32.mxu1 %vm3930_vm4, %v3929_v52  ;;  %p3915_p4 = pnand %p3914_p3, %p3908_p0 }
0x1cc4   :  { %3875 = vmatprep.subr.mxu0 %v3929_v52  ;;  %3882 = vmatprep.subr.mxu1 %v3929_v52 }
0x1d7f   :  { %v2967_v1 = vpop.f32.mrf.mxu0  ;;  %v3037_v2 = vpop.f32.mrf.mxu1 }
0x1d80   :  { %v3041_v3 = vsel %vm658_vm14, %v2967_v1, %v3037_v2  ;;  %v3042_v4 = vsel %vm658_vm14, %v3037_v2, %v2967_v1 }
0x1d81   :  { %vm3043_vm13 = vcmp.lt.f32.partialorder %v3041_v3, %v2874_v43  ;;  %v3853_v5 = vpop.f32.mrf.mxu0  ;;  %v3860_v6 = vpop.f32.mrf.mxu1 }
0x1d82   :  { %vm3045_vm1 = vmand %vm3043_vm13, %vm3044_vm8  ;;  %vm3392_vm8 = vcmp.gt.s32.totalorder %v4040_v38, 0 }
0x1d83   :  { %v3046_v7 = vsel %vm3045_vm1, %v3041_v3, %v2874_v43  ;;  %v4619_v8 = vsel %vm3045_vm1, %v3042_v4, %v2875_v44 }
0x1d84   :  { %v3048_v9 = vsel %vm4608_vm12, 1e+30, %v3046_v7 }
0x1d85   :  { %v3050_v10 = vand.u32 4294967280, %v3048_v9 }
0x1d87   :  { %v3051_v12 = vor.u32 %v3050_v10, %v4040_v38 }
0x1d89   :  { %v3052_v14 = vsel %vm815_vm6, %v3051_v12, 2147483647 }
0x1d8a   :  { %v3054_v16 = vshra.s32 %v3052_v14, 16  ;;  %v3053_v20 = vand.u32 65535, %v3052_v14 }
0x1d8c   :  { %v3056_v18 = vcvt.s32.f32 %v3054_v16  ;;  %v3055_v24 = vcvt.s32.f32 %v3053_v20 }
0x1d8e   :  { %3057 = vmin.xlane.f32.xlu0 %v3056_v18 }
0x1e17   :  { %v3058_v23 = vpop.xlane.xlu0 %3057 }
0x1e18   :  { %vm3059_vm3 = vcmp.eq.f32.partialorder %v3056_v18, %v3058_v23  ;;  %v3064_v26 = vcvt.f32.s32 %v3058_v23 }
0x1e19   :  { %v3060_v25 = vsel %vm3059_vm3, %v3055_v24, inf  ;;  %vm3405_vm3 = vcmask 1041408  }
0x1e1a   :  { %3061 = vmin.xlane.f32.xlu1 %v3060_v25  ;;  %v3065_v27 = vshll.u32 %v3064_v26, 16 }
0x1ea3   :  { %v3062_v15 = vpop.xlane.xlu1 %3061 }
0x1ea4   :  { %v3063_v28 = vcvt.f32.s32 %v3062_v15 }
0x1ea6   :  { %v3066_v29 = vadd.s32 %v3065_v27, %v3063_v28 }
0x1ea8   :  { %vm3067_vm5 = vcmp.eq.s32.totalorder %v3051_v12, %v3066_v29 }
0x1ea9   :  { %v3069_v30 = vsel %vm3067_vm5, 1.0, %v3929_v52  ;;  %vm4640_vm7 = vmor %vm4608_vm12, %vm3067_vm5 }
0x1eaa   :  { %3866 = vmatmul.mubr.msk.f32.vlgmr.msra.gmra.mxu0 %vm478_vm2, %v3069_v30  ;;  %3873 = vmatmul.mubr.msk.f32.vlgmr.msra.gmra.mxu1 %vm478_vm2, %v3069_v30 }
0x1eab   :  { %3876 = vmatpush3.msra.mxu0 %v4071_v11  ;;  %3883 = vmatpush3.msra.mxu1 %v4106_v54 }
0x1eac   :  { %3877 = vmatprep.subr.mxu0 %v3929_v52  ;;  %3884 = vmatprep.subr.mxu1 %v3929_v52 }
0x1ead   :  { %3878 = vmatpush3.msra.mxu0 %v4078_v17  ;;  %3885 = vmatpush3.msra.mxu1 %v4110_v58  ;;  %v377_v17 = vsub.f32 %v4094_v21, %v3906_v60  ;;  %v629_v58 = vsel %vm478_vm2, %v4071_v11, -inf }
0x1eae   :  { %3879 = vmatprep.mubr.msk.f32.mxu0 %vm3930_vm4, %v3929_v52  ;;  %3886 = vmatprep.mubr.msk.f32.mxu1 %vm3930_vm4, %v3929_v52  ;;  %vm3216_vm4 = vmxor %vm4640_vm7, %vm3931_vm15 }
0x1eaf   :  { %v379_v62 = vmul.f32 %v377_v17, %v377_v17 }
0x1eb1   :  { %v383_v63 = vsel %vm35_vm0, %v379_v62, 0.0 }
0x1f6a   :  { %v3139_v32 = vpop.f32.mrf.mxu0  ;;  %v3209_v33 = vpop.f32.mrf.mxu1 }
0x1f6b   :  { %v3213_v34 = vsel %vm658_vm14, %v3139_v32, %v3209_v33  ;;  %v4648_v35 = vsel %vm658_vm14, %v3209_v33, %v3139_v32 }
0x1f6c   :  { %vm3215_vm9 = vcmp.lt.f32.partialorder %v3213_v34, %v3046_v7  ;;  %v3867_v36 = vpop.f32.mrf.mxu0  ;;  %v3874_v37 = vpop.f32.mrf.mxu1 }
0x1f6d   :  { %vm4653_vm10 = vmand %vm3215_vm9, %vm3216_vm4 }
0x1f6e   :  { %v4659_v40 = vsel %vm4653_vm10, %v3213_v34, %v3046_v7  ;;  %v3219_v41 = vsel %vm4653_vm10, %v4648_v35, %v4619_v8 }
0x1f6f   :  { %v3220_v42 = vsel %vm4640_vm7, 1e+30, %v4659_v40 }
0x1f70   :  { %v3222_v43 = vand.u32 4294967280, %v3220_v42 }
0x1f72   :  { %v3223_v44 = vor.u32 %v3222_v43, %v4040_v38 }
0x1f74   :  { %v3224_v45 = vsel %vm815_vm6, %v3223_v44, 2147483647 }
0x1f75   :  { %v3226_v46 = vshra.s32 %v3224_v45, 16  ;;  %v3225_v57 = vand.u32 65535, %v3224_v45 }
0x1f77   :  { %v3228_v47 = vcvt.s32.f32 %v3226_v46  ;;  %v3227_v22 = vcvt.s32.f32 %v3225_v57 }
0x1f79   :  { %3229 = vmin.xlane.f32.xlu0 %v3228_v47 }
0x1f7d   :  { %627 = vmax.xlane.f32.xlu0 %v626_v51 }
0x1f81   :  { %643 = vmax.xlane.f32.xlu0 %v642_v53 }
0x1f85   :  { %381 = vadd.xlane.f32.xlu0 %v380_v56 }
0x2002   :  { %v3230_v19 = vpop.xlane.xlu0 %3229 }
0x2003   :  { %vm3231_vm11 = vcmp.eq.f32.partialorder %v3228_v47, %v3230_v19  ;;  %v3236_v0 = vcvt.f32.s32 %v3230_v19 }
0x2004   :  { %v3232_v59 = vsel %vm3231_vm11, %v3227_v22, inf }
0x2005   :  { %3233 = vmin.xlane.f32.xlu1 %v3232_v59  ;;  %v3237_v2 = vshll.u32 %v3236_v0, 16 }
0x2006   :  { %v628_v54 = vpop.xlane.xlu0 %627 }
0x2009   :  { %630 = vmax.xlane.f32.xlu1 %v629_v58 }
0x200a   :  { %v644_v6 = vpop.xlane.xlu0 %643 }
0x200d   :  { %646 = vmax.xlane.f32.xlu1 %v645_v61 }
0x200e   :  { %v382_v51 = vpop.xlane.xlu0 %381 }
0x2011   :  { %384 = vadd.xlane.f32.xlu1 %v383_v63 }
0x208e   :  { %v3234_v1 = vpop.xlane.xlu1 %3233 }
0x208f   :  { %v3235_v3 = vcvt.f32.s32 %v3234_v1 }
0x2091   :  { %v3238_v4 = vadd.s32 %v3237_v2, %v3235_v3 }
0x2092   :  { %v631_v11 = vpop.xlane.xlu1 %630 }
0x2093   :  { %vm3239_vm12 = vcmp.eq.s32.totalorder %v3223_v44, %v3238_v4  ;;  %v632_v9 = vmax.f32 %v628_v54, %v631_v11 }
0x2094   :  { %v3241_v21 = vsel %vm3239_vm12, 1.0, %v3929_v52  ;;  %vm3240_vm0 = vmor %vm4640_vm7, %vm3239_vm12 }
0x2095   :  { %3880 = vmatmul.mubr.msk.f32.vlgmr.msra.gmra.mxu0 %vm478_vm2, %v3241_v21  ;;  %3887 = vmatmul.mubr.msk.f32.vlgmr.msra.gmra.mxu1 %vm478_vm2, %v3241_v21  ;;  %v633_v12 = vrot.slane %v632_v9, 4  ;;  %vm3388_vm13 = vmxor %vm3240_vm0, %vm3931_vm15 }
0x2096   :  { %v647_v5 = vpop.xlane.xlu1 %646 }
0x2097   :  { %v648_v7 = vmax.f32 %v644_v6, %v647_v5  ;;  %v634_v16 = vmax.f32 %v632_v9, %v633_v12 }
0x2099   :  { %v649_v10 = vrot.slane %v648_v7, 4  ;;  %v635_v20 = vrot.slane %v634_v16, 2 }
0x209a   :  { %v385_v39 = vpop.xlane.xlu1 %384 }
0x209b   :  { %v650_v14 = vmax.f32 %v648_v7, %v649_v10  ;;  %v636_v24 = vmax.f32 %v634_v16, %v635_v20  ;;  %v386_v8 = vadd.f32 %v385_v39, %v382_v51 }
0x209d   :  { %v651_v18 = vrot.slane %v650_v14, 2  ;;  %v637_v52 = vrot.slane %v636_v24, 1  ;;  %v387_v35 = vrot.slane %v386_v8, 4 }
0x209f   :  { %v652_v23 = vmax.f32 %v650_v14, %v651_v18  ;;  %v638_v15 = vmax.f32 %v636_v24, %v637_v52 }
0x20a1   :  { %v653_v25 = vrot.slane %v652_v23, 1  ;;  %v639_v28 = vmax.f32 %v638_v15, 1e-12 }
0x20a3   :  { %v654_v26 = vmax.f32 %v652_v23, %v653_v25 }
0x20a5   :  { %v655_v27 = vmax.f32 %v654_v26, 1e-12 }
0x20a7   :  { %3901 = vrcp.f32 %v655_v27 }
0x20a8   :  { %3903 = vrcp.f32 %v639_v28 }
0x20b4   :  { %v3902_v32 = vpop.eup %3901 }
0x20b5   :  { %v3904_v37 = vpop.eup %3903 }
0x20b6   :  { %v3396_v44 = vsel %vm658_vm14, %v3902_v32, %v3904_v37  ;;  %v3395_v38 = vsel %vm658_vm14, %v3904_v37, %v3902_v32 }
0x2155   :  { %v3311_v29 = vpop.f32.mrf.mxu0  ;;  %v3381_v30 = vpop.f32.mrf.mxu1 }
0x2156   :  { %v3385_v33 = vsel %vm658_vm14, %v3311_v29, %v3381_v30  ;;  %v3386_v42 = vsel %vm658_vm14, %v3381_v30, %v3311_v29  ;;  %vm3415_vm14 = vcmask 0  }
0x2157   :  { %vm3387_vm2 = vcmp.lt.f32.partialorder %v3385_v33, %v4659_v40  ;;  %v3881_v34 = vpop.f32.mrf.mxu0  ;;  %v3888_v36 = vpop.f32.mrf.mxu1 }
0x2158   :  { %vm3389_vm1 = vmand %vm3387_vm2, %vm3388_vm13 }
0x2159   :  { %v3390_v31 = vsel %vm3389_vm1, %v3385_v33, %v4659_v40  ;;  %v3391_v43 = vsel %vm3389_vm1, %v3386_v42, %v3219_v41  ;;  %v388_v41 = vadd.f32 %v387_v35, %v386_v8 }
0x215a   :  { %v3398_v45 = vmul.f32 %v3396_v44, %v3391_v43  ;;  %v3393_v46 = vsel %vm3392_vm8, %v3390_v31, 0.0 }
0x215b   :  { %v3397_v47 = vmul.f32 %v3395_v38, %v3393_v46  ;;  %vm3394_vm15 = vcmp.gt.f32.partialorder %v3393_v46, 1.0  ;;  %v389_v53 = vrot.slane %v388_v41, 2 }
0x215d   :  { %v3399_v48 = vsub.f32 %v3397_v47, %v3398_v45  ;;  %v390_v57 = vadd.f32 %v389_v53, %v388_v41 }
0x215f   :  { %v3400_v49 = vmul.f32 %v3399_v48, %v3399_v48  ;;  %v391_v22 = vrot.slane %v390_v57, 1 }
0x2161   :  { %v3401_v50 = vsel %vm3394_vm15, %v3400_v49, 0.0  ;;  %v392_v58 = vadd.f32 %v391_v22, %v390_v57 }
0x2162   :  { %v3402_v40 = vsel %vm815_vm6, %v3401_v50, 0.0 }
0x2163   :  { %3403 = vadd.xlane.f32.xlu0 %v3402_v40  ;;  %v393_v62 = vmul.f32 0.00390625, %v392_v58 }
0x21ec   :  { %v3404_v55 = vpop.xlane.xlu0 %3403 }
0x21ed   :  { %v3406_v56 = vsel %vm3405_vm3, %v3404_v55, 0.0 }
0x21ee   :  { %v3407_v13 = vrot.slane %v3406_v56, 4 }
0x21f0   :  { %v3408_v19 = vadd.f32 %v3407_v13, %v3406_v56 }
0x21f2   :  { %v3409_v59 = vrot.slane %v3408_v19, 2 }
0x21f4   :  { %v3410_v60 = vadd.f32 %v3409_v59, %v3408_v19 }
0x21f6   :  { %v3411_v17 = vrot.slane %v3410_v60, 1 }
0x21f8   :  { %v3412_v61 = vadd.f32 %v3411_v17, %v3410_v60 }
0x21fa   :  { %v3413_v63 = vmul.f32 0.5, %v3412_v61 }
0x21fc   :  { %v3414_v0 = vadd.f32 %v3413_v63, %v393_v62 }
0x21fe   :  { %3416 = vst.msk [vmem:[#allocation2] sm:$0x1] %vm3415_vm14, %v3414_v0 }
0x21ff   :  { %3918 = shalt.err (!%p3915_p4)
}
0x2200   :  { %3426 = dma.vmem_to_hbm [thread:$0]  %s3424_s22, 16, %s4719_s2, [#allocation3]  }
0x2201   :  { %3927 = dma.done.wait [#allocation3], 16  }
0x2202   :  { %3928 = vsyncadd [#allocation3], 4294967280 }
0x2203   :  { %3430 = vsyncpa [#allocation3], 1 }

</bundles_post_ra>
